<compile_context>
chip_gen: v7x
topology: tpu7x:2x2x1
jax: 0.10.0
libtpu: 0.0.40
codegen_flags: <defaults>
</compile_context>

<pallas_src>
import math

import jax
import jax.numpy as jnp
from jax.experimental import pallas as pl
from jax.experimental.pallas import tpu as pltpu


# ---------------------------------------------------------------------------
# Fused kernel: multi-layer LSTM encoder + VAE head in one pallas_call.
# ---------------------------------------------------------------------------
def make_fused_kernel(num_layers, seq_len, batch_blk, hidden, out_window,
                      packed_width):
    T, Bb, H, OW, P = seq_len, batch_blk, hidden, out_window, packed_width

    def kernel(*refs):
        n_w = 3 * num_layers
        x_ref = refs[0]                                   # (T, Bb, D0) time-major block
        w_refs = refs[1:1 + n_w]                          # per layer: w_ih, w_hh, b
        (ws_ref, bs_ref, wmulv_ref, bmulv_ref,
         wd_ref, bd_ref, eps_ref) = refs[1 + n_w:1 + n_w + 7]
        out_ref = refs[1 + n_w + 7]                       # (Bb, P) packed output
        hseq_ref = refs[1 + n_w + 8]                      # VMEM scratch (T, Bb, H)

        # Hoisted activation scale/offset vectors.  One tanh over the whole
        # (Bb, 4H) gate vreg implements:
        #   sigmoid(x) = 0.5*tanh(0.5*x) + 0.5   on the i, f, o columns
        #   tanh(x)    = 1.0*tanh(1.0*x) + 0.0   on the g column
        # PyTorch gate column order (i, f, g, o) is preserved.
        scl = jnp.concatenate(
            [jnp.full((Bb, 2 * H), 0.5, jnp.float32),   # i, f
             jnp.full((Bb, H), 1.0, jnp.float32),       # g
             jnp.full((Bb, H), 0.5, jnp.float32)],      # o
            axis=1)
        off = jnp.concatenate(
            [jnp.full((Bb, 2 * H), 0.5, jnp.float32),
             jnp.zeros((Bb, H), jnp.float32),
             jnp.full((Bb, H), 0.5, jnp.float32)],
            axis=1)

        h = None
        for l in range(num_layers):                       # static layer loop
            w_ih = w_refs[3 * l][...]                     # (D_l, 4H)
            w_hh = w_refs[3 * l + 1][...]                 # (H, 4H)
            b = w_refs[3 * l + 2][...]                    # (1, 4H)
            d_in = w_ih.shape[0]

            # Hoisted input projection: one big time-major matmul per layer,
            # bias folded in once.
            if l == 0:
                src = x_ref[...].reshape(T * Bb, d_in)
            else:
                src = hseq_ref[...].reshape(T * Bb, d_in)
            xp = (jnp.dot(src, w_ih, preferred_element_type=jnp.float32) + b)
            xp = xp.reshape(T, Bb, 4 * H)                 # xp[t]: free leading index

            h = jnp.zeros((Bb, H), jnp.float32)
            c = jnp.zeros((Bb, H), jnp.float32)
            # T is small & static: fully unrolled so the scheduler can overlap
            # the MXU drain with the single EUP tanh of the adjacent step.
            for t in range(T):
                gates = xp[t] + jnp.dot(h, w_hh,
                                        preferred_element_type=jnp.float32)
                act = jnp.tanh(gates * scl) * scl + off   # 1 EUP push / step
                i_g = act[:, 0 * H:1 * H]
                f_g = act[:, 1 * H:2 * H]
                g_g = act[:, 2 * H:3 * H]
                o_g = act[:, 3 * H:4 * H]
                c = f_g * c + i_g * g_g
                h = o_g * jnp.tanh(c)
                if l < num_layers - 1:                    # last layer: no dead stores
                    hseq_ref[t] = h                       # time-major scratch, no stack

        # ---- fused VAE head (h is h_n[-1]) ----
        encoded = jnp.tanh(
            jnp.dot(h, ws_ref[...], preferred_element_type=jnp.float32)
            + bs_ref[...])
        # mu and log_var from a single (H, 2H) matmul.
        mulv = (jnp.dot(encoded, wmulv_ref[...],
                        preferred_element_type=jnp.float32) + bmulv_ref[...])
        mu = mulv[:, :H]
        log_var = mulv[:, H:]
        z = mu + eps_ref[...] * jnp.exp(0.5 * log_var)
        decoded = (jnp.dot(encoded * (1.0 + z), wd_ref[...],
                           preferred_element_type=jnp.float32) + bd_ref[...])

        # Lane-dense packed output: [decoded | mu | log_var | pad] ->
        # a single unmasked full-width store.
        parts = [decoded, mu, log_var]
        pad = P - (OW + 2 * H)
        if pad:
            parts.append(jnp.zeros((Bb, pad), jnp.float32))
        out_ref[...] = jnp.concatenate(parts, axis=1)

    return kernel


# ---------------------------------------------------------------------------
# Wrapper (single pallas_call).  All static sizes come from array shapes /
# pytree structure, never from traced scalars.
# ---------------------------------------------------------------------------
def lstm_vae_forward(x, params, eps):
    """x: (B, T, num_input) float32; returns (decoded, mu, log_var)."""
    B, T, D0 = x.shape
    num_layers = len(params["lstm"])               # static pytree structure
    H = params["scale_w"].shape[0]                 # static shape
    OW = params["dec_w"].shape[1]                  # static shape
    P = pl.cdiv(OW + 2 * H, 128) * 128             # packed, lane-dense out width

    # v7x has 2 TensorCores/chip: shard independent batch rows across cores
    # whenever the per-core block keeps an 8-aligned sublane dim.
    G = 2 if (B % 2 == 0 and (B // 2) % 8 == 0) else 1
    Bb = B // G

    # Time-major presentation of x (cheap wrapper-side layout plumbing).
    x_tm = jnp.transpose(x, (1, 0, 2))             # (T, B, D0)

    inputs = [x_tm]
    in_specs = [pl.BlockSpec((T, Bb, D0), lambda i: (0, i, 0))]
    for (w_ih, w_hh, b) in params["lstm"]:
        inputs += [w_ih, w_hh, b]
        in_specs += [
            pl.BlockSpec(w_ih.shape, lambda i: (0, 0)),   # replicated weights
            pl.BlockSpec(w_hh.shape, lambda i: (0, 0)),
            pl.BlockSpec(b.shape, lambda i: (0, 0)),
        ]
    head = [params["scale_w"], params["scale_b"],
            params["mulv_w"], params["mulv_b"],
            params["dec_w"], params["dec_b"]]
    inputs += head
    in_specs += [pl.BlockSpec(a.shape, lambda i: (0, 0)) for a in head]
    inputs.append(eps)
    in_specs.append(pl.BlockSpec((Bb, H), lambda i: (i, 0)))

    # Advisory cost estimate — the kernel is launch/latency bound at small
    # sizes; this helps XLA schedule/overlap the tiny custom call.
    flops = 0
    for l in range(num_layers):
        d_in = D0 if l == 0 else H
        flops += 2 * B * T * (d_in + H) * 4 * H
    flops += 2 * B * H * (H + 2 * H + OW)
    transcendentals = B * T * num_layers * 5 * H + 2 * B * H
    bytes_accessed = sum(int(a.size) * 4 for a in inputs) + B * P * 4

    packed = pl.pallas_call(
        make_fused_kernel(num_layers, T, Bb, H, OW, P),
        grid=(G,),
        out_shape=jax.ShapeDtypeStruct((B, P), jnp.float32),
        in_specs=in_specs,
        out_specs=pl.BlockSpec((Bb, P), lambda i: (i, 0)),
        scratch_shapes=[pltpu.VMEM((T, Bb, H), jnp.float32)],
        compiler_params=pltpu.CompilerParams(
            dimension_semantics=("parallel",)),
        cost_estimate=pl.CostEstimate(
            flops=flops,
            transcendentals=transcendentals,
            bytes_accessed=bytes_accessed),
    )(*inputs)

    decoded = packed[:, :OW]
    mu = packed[:, OW:OW + H]
    log_var = packed[:, OW + H:OW + 2 * H]
    # decoded.view(-1, output_window) is a no-op here (already (B, OW)).
    return decoded, mu, log_var


# ---------------------------------------------------------------------------
# Deterministic parameter init (matches PyTorch module shapes; weights are
# pre-transposed to (in_features, out_features), the two LSTM biases are
# folded, and mu/log_var are packed into one (H, 2H) linear).
# ---------------------------------------------------------------------------
def init_params(key, num_input, hidden, num_layers, output_window):
    k = 1.0 / math.sqrt(hidden)

    def uni(key, shape):
        return jax.random.uniform(key, shape, jnp.float32, minval=-k, maxval=k)

    keys = iter(jax.random.split(key, 4 * num_layers + 8))
    lstm = []
    for l in range(num_layers):
        din = num_input if l == 0 else hidden
        w_ih = uni(next(keys), (4 * hidden, din))          # torch: (4H, D_in)
        w_hh = uni(next(keys), (4 * hidden, hidden))       # torch: (4H, H)
        b_ih = uni(next(keys), (4 * hidden,))
        b_hh = uni(next(keys), (4 * hidden,))
        # pre-transpose, fold the two biases together; gate order (i,f,g,o)
        # is kept exactly as PyTorch.
        lstm.append((w_ih.T, w_hh.T, (b_ih + b_hh).reshape(1, -1)))

    scale_w = uni(next(keys), (hidden, hidden)).T
    scale_b = uni(next(keys), (hidden,)).reshape(1, -1)
    mu_w = uni(next(keys), (hidden, hidden)).T
    mu_b = uni(next(keys), (hidden,)).reshape(1, -1)
    lv_w = uni(next(keys), (hidden, hidden)).T
    lv_b = uni(next(keys), (hidden,)).reshape(1, -1)
    dec_w = uni(next(keys), (output_window, hidden)).T
    dec_b = uni(next(keys), (output_window,)).reshape(1, -1)

    return {
        "lstm": lstm,
        "scale_w": scale_w, "scale_b": scale_b,
        # mu and log_var fused into one (H, 2H) linear
        "mulv_w": jnp.concatenate([mu_w, lv_w], axis=1),
        "mulv_b": jnp.concatenate([mu_b, lv_b], axis=1),
        "dec_w": dec_w, "dec_b": dec_b,
    }


if __name__ == "__main__":
    # Small shapes consistent with the module's forward.  B=16 exercises the
    # 2-core grid path (8 rows/core, sublane-aligned).
    B, T = 16, 8                # batch, sequence length
    NUM_INPUT = 6               # num_input
    HIDDEN = 32                 # num_hidden
    NUM_LAYERS = 2              # num_layers (dropout inactive in eval)
    OUTPUT_WINDOW = 16          # output_window
    # output_dim is unused by forward()

    key = jax.random.PRNGKey(0)
    k_x, k_p, k_eps = jax.random.split(key, 3)

    x = jax.random.normal(k_x, (B, T, NUM_INPUT), jnp.float32)
    params = init_params(k_p, NUM_INPUT, HIDDEN, NUM_LAYERS, OUTPUT_WINDOW)
    eps = jax.random.normal(k_eps, (B, HIDDEN), jnp.float32)   # reparametrization noise

    decoded, mu, log_var = jax.jit(lstm_vae_forward)(x, params, eps)
    jax.block_until_ready((decoded, mu, log_var))

    assert decoded.shape == (B, OUTPUT_WINDOW)
    assert mu.shape == (B, HIDDEN)
    assert log_var.shape == (B, HIDDEN)
    assert bool(jnp.all(jnp.isfinite(decoded)))
    assert bool(jnp.all(jnp.isfinite(mu)))
    assert bool(jnp.all(jnp.isfinite(log_var)))
    print("KERNEL_OK")
</pallas_src>

<mosaic_0001>
module attributes {stable_mosaic.version = 11 : i64} {
  func.func @kernel(%arg0: i32, %arg1: memref<8x8x6xf32, #tpu.memory_space<vmem>>, %arg2: memref<6x128xf32, #tpu.memory_space<vmem>>, %arg3: memref<32x128xf32, #tpu.memory_space<vmem>>, %arg4: memref<1x128xf32, #tpu.memory_space<vmem>>, %arg5: memref<32x128xf32, #tpu.memory_space<vmem>>, %arg6: memref<32x128xf32, #tpu.memory_space<vmem>>, %arg7: memref<1x128xf32, #tpu.memory_space<vmem>>, %arg8: memref<32x32xf32, #tpu.memory_space<vmem>>, %arg9: memref<1x32xf32, #tpu.memory_space<vmem>>, %arg10: memref<32x64xf32, #tpu.memory_space<vmem>>, %arg11: memref<1x64xf32, #tpu.memory_space<vmem>>, %arg12: memref<32x16xf32, #tpu.memory_space<vmem>>, %arg13: memref<1x16xf32, #tpu.memory_space<vmem>>, %arg14: memref<8x32xf32, #tpu.memory_space<vmem>>, %arg15: memref<8x128xf32, #tpu.memory_space<vmem>>, %arg16: memref<8x8x32xf32, #tpu.memory_space<vmem>>) attributes {dimension_semantics = [#tpu.dimension_semantics<parallel>], iteration_bounds = array<i64: 2>, scalar_prefetch = 0 : i64, scratch_operands = 1 : i64, tpu.core_type = #tpu.core_type<tc>, window_params = [{transform_indices = @transform_0, window_bounds = array<i64: 8, 8, 6>}, {pipeline_mode = #tpu.pipeline_mode<synchronous>, transform_indices = @transform_1, window_bounds = array<i64: 6, 128>}, {pipeline_mode = #tpu.pipeline_mode<synchronous>, transform_indices = @transform_2, window_bounds = array<i64: 32, 128>}, {pipeline_mode = #tpu.pipeline_mode<synchronous>, transform_indices = @transform_3, window_bounds = array<i64: 1, 128>}, {pipeline_mode = #tpu.pipeline_mode<synchronous>, transform_indices = @transform_4, window_bounds = array<i64: 32, 128>}, {pipeline_mode = #tpu.pipeline_mode<synchronous>, transform_indices = @transform_5, window_bounds = array<i64: 32, 128>}, {pipeline_mode = #tpu.pipeline_mode<synchronous>, transform_indices = @transform_6, window_bounds = array<i64: 1, 128>}, {pipeline_mode = #tpu.pipeline_mode<synchronous>, transform_indices = @transform_7, window_bounds = array<i64: 32, 32>}, {pipeline_mode = #tpu.pipeline_mode<synchronous>, transform_indices = @transform_8, window_bounds = array<i64: 1, 32>}, {pipeline_mode = #tpu.pipeline_mode<synchronous>, transform_indices = @transform_9, window_bounds = array<i64: 32, 64>}, {pipeline_mode = #tpu.pipeline_mode<synchronous>, transform_indices = @transform_10, window_bounds = array<i64: 1, 64>}, {pipeline_mode = #tpu.pipeline_mode<synchronous>, transform_indices = @transform_11, window_bounds = array<i64: 32, 16>}, {pipeline_mode = #tpu.pipeline_mode<synchronous>, transform_indices = @transform_12, window_bounds = array<i64: 1, 16>}, {transform_indices = @transform_13, window_bounds = array<i64: 8, 32>}, {transform_indices = @transform_14, window_bounds = array<i64: 8, 128>}]} {
    %cst = arith.constant 5.000000e-01 : f32
    %0 = vector.broadcast %cst : f32 to vector<8x64xf32>
    %cst_0 = arith.constant 1.000000e+00 : f32
    %1 = vector.broadcast %cst_0 : f32 to vector<8x32xf32>
    %cst_1 = arith.constant 5.000000e-01 : f32
    %2 = vector.broadcast %cst_1 : f32 to vector<8x32xf32>
    %3 = tpu.concatenate %0, %1, %2 in 1 : vector<8x64xf32>, vector<8x32xf32>, vector<8x32xf32> -> vector<8x128xf32>
    %cst_2 = arith.constant 5.000000e-01 : f32
    %4 = vector.broadcast %cst_2 : f32 to vector<8x64xf32>
    %cst_3 = arith.constant 0.000000e+00 : f32
    %5 = vector.broadcast %cst_3 : f32 to vector<8x32xf32>
    %cst_4 = arith.constant 5.000000e-01 : f32
    %6 = vector.broadcast %cst_4 : f32 to vector<8x32xf32>
    %7 = tpu.concatenate %4, %5, %6 in 1 : vector<8x64xf32>, vector<8x32xf32>, vector<8x32xf32> -> vector<8x128xf32>
    %c0 = arith.constant 0 : index
    %c0_5 = arith.constant 0 : index
    %8 = vector.load %arg2[%c0, %c0_5] : memref<6x128xf32, #tpu.memory_space<vmem>>, vector<6x128xf32>
    %c0_6 = arith.constant 0 : index
    %c0_7 = arith.constant 0 : index
    %9 = vector.load %arg3[%c0_6, %c0_7] : memref<32x128xf32, #tpu.memory_space<vmem>>, vector<32x128xf32>
    %c0_8 = arith.constant 0 : index
    %c0_9 = arith.constant 0 : index
    %10 = vector.load %arg4[%c0_8, %c0_9] : memref<1x128xf32, #tpu.memory_space<vmem>>, vector<1x128xf32>
    %c0_10 = arith.constant 0 : index
    %c0_11 = arith.constant 0 : index
    %c0_12 = arith.constant 0 : index
    %11 = vector.load %arg1[%c0_10, %c0_11, %c0_12] : memref<8x8x6xf32, #tpu.memory_space<vmem>>, vector<8x8x6xf32>
    %12 = vector.shape_cast %11 : vector<8x8x6xf32> to vector<64x6xf32>
    %cst_13 = arith.constant dense<0.000000e+00> : vector<64x128xf32>
    %13 = tpu.matmul %12, %8, %cst_13 {dimension_numbers = #tpu.dot_dimension_numbers<[1], [0], [0], [1], [0, 0, 1, 1], [], []>} : vector<64x6xf32>, vector<6x128xf32>, vector<64x128xf32> -> vector<64x128xf32>
    %14 = vector.broadcast %10 : vector<1x128xf32> to vector<64x128xf32>
    %15 = arith.addf %13, %14 : vector<64x128xf32>
    %16 = vector.shape_cast %15 : vector<64x128xf32> to vector<8x8x128xf32>
    %cst_14 = arith.constant 0.000000e+00 : f32
    %17 = vector.broadcast %cst_14 : f32 to vector<8x32xf32>
    %cst_15 = arith.constant 0.000000e+00 : f32
    %18 = vector.broadcast %cst_15 : f32 to vector<8x32xf32>
    %19 = vector.extract_strided_slice %16 {offsets = [0, 0, 0], sizes = [1, 8, 128], strides = [1, 1, 1]} : vector<8x8x128xf32> to vector<1x8x128xf32>
    %20 = vector.shape_cast %19 : vector<1x8x128xf32> to vector<8x128xf32>
    %cst_16 = arith.constant dense<0.000000e+00> : vector<8x128xf32>
    %21 = tpu.matmul %17, %9, %cst_16 {dimension_numbers = #tpu.dot_dimension_numbers<[1], [0], [0], [1], [0, 0, 1, 1], [], []>} : vector<8x32xf32>, vector<32x128xf32>, vector<8x128xf32> -> vector<8x128xf32>
    %22 = arith.addf %20, %21 : vector<8x128xf32>
    %23 = arith.mulf %22, %3 : vector<8x128xf32>
    %24 = math.tanh %23 : vector<8x128xf32>
    %25 = arith.mulf %24, %3 : vector<8x128xf32>
    %26 = arith.addf %25, %7 : vector<8x128xf32>
    %27 = vector.extract_strided_slice %26 {offsets = [0, 0], sizes = [8, 32], strides = [1, 1]} : vector<8x128xf32> to vector<8x32xf32>
    %28 = vector.extract_strided_slice %26 {offsets = [0, 32], sizes = [8, 32], strides = [1, 1]} : vector<8x128xf32> to vector<8x32xf32>
    %29 = vector.extract_strided_slice %26 {offsets = [0, 64], sizes = [8, 32], strides = [1, 1]} : vector<8x128xf32> to vector<8x32xf32>
    %30 = vector.extract_strided_slice %26 {offsets = [0, 96], sizes = [8, 32], strides = [1, 1]} : vector<8x128xf32> to vector<8x32xf32>
    %31 = arith.mulf %28, %18 : vector<8x32xf32>
    %32 = arith.mulf %27, %29 : vector<8x32xf32>
    %33 = arith.addf %31, %32 : vector<8x32xf32>
    %34 = math.tanh %33 : vector<8x32xf32>
    %35 = arith.mulf %30, %34 : vector<8x32xf32>
    %c0_17 = arith.constant 0 : index
    %c0_18 = arith.constant 0 : index
    %c0_19 = arith.constant 0 : index
    %36 = vector.load %arg16[%c0_17, %c0_18, %c0_19] : memref<8x8x32xf32, #tpu.memory_space<vmem>>, vector<1x8x32xf32>
    %37 = vector.shape_cast %36 : vector<1x8x32xf32> to vector<8x32xf32>
    %38 = vector.shape_cast %35 : vector<8x32xf32> to vector<1x8x32xf32>
    tpu.vector_store %arg16[%c0_17, %c0_18, %c0_19], %38 {strides = array<i32>} : memref<8x8x32xf32, #tpu.memory_space<vmem>>, vector<1x8x32xf32>,
    %39 = vector.extract_strided_slice %16 {offsets = [1, 0, 0], sizes = [1, 8, 128], strides = [1, 1, 1]} : vector<8x8x128xf32> to vector<1x8x128xf32>
    %40 = vector.shape_cast %39 : vector<1x8x128xf32> to vector<8x128xf32>
    %cst_20 = arith.constant dense<0.000000e+00> : vector<8x128xf32>
    %41 = tpu.matmul %35, %9, %cst_20 {dimension_numbers = #tpu.dot_dimension_numbers<[1], [0], [0], [1], [0, 0, 1, 1], [], []>} : vector<8x32xf32>, vector<32x128xf32>, vector<8x128xf32> -> vector<8x128xf32>
    %42 = arith.addf %40, %41 : vector<8x128xf32>
    %43 = arith.mulf %42, %3 : vector<8x128xf32>
    %44 = math.tanh %43 : vector<8x128xf32>
    %45 = arith.mulf %44, %3 : vector<8x128xf32>
    %46 = arith.addf %45, %7 : vector<8x128xf32>
    %47 = vector.extract_strided_slice %46 {offsets = [0, 0], sizes = [8, 32], strides = [1, 1]} : vector<8x128xf32> to vector<8x32xf32>
    %48 = vector.extract_strided_slice %46 {offsets = [0, 32], sizes = [8, 32], strides = [1, 1]} : vector<8x128xf32> to vector<8x32xf32>
    %49 = vector.extract_strided_slice %46 {offsets = [0, 64], sizes = [8, 32], strides = [1, 1]} : vector<8x128xf32> to vector<8x32xf32>
    %50 = vector.extract_strided_slice %46 {offsets = [0, 96], sizes = [8, 32], strides = [1, 1]} : vector<8x128xf32> to vector<8x32xf32>
    %51 = arith.mulf %48, %33 : vector<8x32xf32>
    %52 = arith.mulf %47, %49 : vector<8x32xf32>
    %53 = arith.addf %51, %52 : vector<8x32xf32>
    %54 = math.tanh %53 : vector<8x32xf32>
    %55 = arith.mulf %50, %54 : vector<8x32xf32>
    %c1 = arith.constant 1 : index
    %c0_21 = arith.constant 0 : index
    %c0_22 = arith.constant 0 : index
    %56 = vector.load %arg16[%c1, %c0_21, %c0_22] : memref<8x8x32xf32, #tpu.memory_space<vmem>>, vector<1x8x32xf32>
    %57 = vector.shape_cast %56 : vector<1x8x32xf32> to vector<8x32xf32>
    %58 = vector.shape_cast %55 : vector<8x32xf32> to vector<1x8x32xf32>
    tpu.vector_store %arg16[%c1, %c0_21, %c0_22], %58 {strides = array<i32>} : memref<8x8x32xf32, #tpu.memory_space<vmem>>, vector<1x8x32xf32>,
    %59 = vector.extract_strided_slice %16 {offsets = [2, 0, 0], sizes = [1, 8, 128], strides = [1, 1, 1]} : vector<8x8x128xf32> to vector<1x8x128xf32>
    %60 = vector.shape_cast %59 : vector<1x8x128xf32> to vector<8x128xf32>
    %cst_23 = arith.constant dense<0.000000e+00> : vector<8x128xf32>
    %61 = tpu.matmul %55, %9, %cst_23 {dimension_numbers = #tpu.dot_dimension_numbers<[1], [0], [0], [1], [0, 0, 1, 1], [], []>} : vector<8x32xf32>, vector<32x128xf32>, vector<8x128xf32> -> vector<8x128xf32>
    %62 = arith.addf %60, %61 : vector<8x128xf32>
    %63 = arith.mulf %62, %3 : vector<8x128xf32>
    %64 = math.tanh %63 : vector<8x128xf32>
    %65 = arith.mulf %64, %3 : vector<8x128xf32>
    %66 = arith.addf %65, %7 : vector<8x128xf32>
    %67 = vector.extract_strided_slice %66 {offsets = [0, 0], sizes = [8, 32], strides = [1, 1]} : vector<8x128xf32> to vector<8x32xf32>
    %68 = vector.extract_strided_slice %66 {offsets = [0, 32], sizes = [8, 32], strides = [1, 1]} : vector<8x128xf32> to vector<8x32xf32>
    %69 = vector.extract_strided_slice %66 {offsets = [0, 64], sizes = [8, 32], strides = [1, 1]} : vector<8x128xf32> to vector<8x32xf32>
    %70 = vector.extract_strided_slice %66 {offsets = [0, 96], sizes = [8, 32], strides = [1, 1]} : vector<8x128xf32> to vector<8x32xf32>
    %71 = arith.mulf %68, %53 : vector<8x32xf32>
    %72 = arith.mulf %67, %69 : vector<8x32xf32>
    %73 = arith.addf %71, %72 : vector<8x32xf32>
    %74 = math.tanh %73 : vector<8x32xf32>
    %75 = arith.mulf %70, %74 : vector<8x32xf32>
    %c2 = arith.constant 2 : index
    %c0_24 = arith.constant 0 : index
    %c0_25 = arith.constant 0 : index
    %76 = vector.load %arg16[%c2, %c0_24, %c0_25] : memref<8x8x32xf32, #tpu.memory_space<vmem>>, vector<1x8x32xf32>
    %77 = vector.shape_cast %76 : vector<1x8x32xf32> to vector<8x32xf32>
    %78 = vector.shape_cast %75 : vector<8x32xf32> to vector<1x8x32xf32>
    tpu.vector_store %arg16[%c2, %c0_24, %c0_25], %78 {strides = array<i32>} : memref<8x8x32xf32, #tpu.memory_space<vmem>>, vector<1x8x32xf32>,
    %79 = vector.extract_strided_slice %16 {offsets = [3, 0, 0], sizes = [1, 8, 128], strides = [1, 1, 1]} : vector<8x8x128xf32> to vector<1x8x128xf32>
    %80 = vector.shape_cast %79 : vector<1x8x128xf32> to vector<8x128xf32>
    %cst_26 = arith.constant dense<0.000000e+00> : vector<8x128xf32>
    %81 = tpu.matmul %75, %9, %cst_26 {dimension_numbers = #tpu.dot_dimension_numbers<[1], [0], [0], [1], [0, 0, 1, 1], [], []>} : vector<8x32xf32>, vector<32x128xf32>, vector<8x128xf32> -> vector<8x128xf32>
    %82 = arith.addf %80, %81 : vector<8x128xf32>
    %83 = arith.mulf %82, %3 : vector<8x128xf32>
    %84 = math.tanh %83 : vector<8x128xf32>
    %85 = arith.mulf %84, %3 : vector<8x128xf32>
    %86 = arith.addf %85, %7 : vector<8x128xf32>
    %87 = vector.extract_strided_slice %86 {offsets = [0, 0], sizes = [8, 32], strides = [1, 1]} : vector<8x128xf32> to vector<8x32xf32>
    %88 = vector.extract_strided_slice %86 {offsets = [0, 32], sizes = [8, 32], strides = [1, 1]} : vector<8x128xf32> to vector<8x32xf32>
    %89 = vector.extract_strided_slice %86 {offsets = [0, 64], sizes = [8, 32], strides = [1, 1]} : vector<8x128xf32> to vector<8x32xf32>
    %90 = vector.extract_strided_slice %86 {offsets = [0, 96], sizes = [8, 32], strides = [1, 1]} : vector<8x128xf32> to vector<8x32xf32>
    %91 = arith.mulf %88, %73 : vector<8x32xf32>
    %92 = arith.mulf %87, %89 : vector<8x32xf32>
    %93 = arith.addf %91, %92 : vector<8x32xf32>
    %94 = math.tanh %93 : vector<8x32xf32>
    %95 = arith.mulf %90, %94 : vector<8x32xf32>
    %c3 = arith.constant 3 : index
    %c0_27 = arith.constant 0 : index
    %c0_28 = arith.constant 0 : index
    %96 = vector.load %arg16[%c3, %c0_27, %c0_28] : memref<8x8x32xf32, #tpu.memory_space<vmem>>, vector<1x8x32xf32>
    %97 = vector.shape_cast %96 : vector<1x8x32xf32> to vector<8x32xf32>
    %98 = vector.shape_cast %95 : vector<8x32xf32> to vector<1x8x32xf32>
    tpu.vector_store %arg16[%c3, %c0_27, %c0_28], %98 {strides = array<i32>} : memref<8x8x32xf32, #tpu.memory_space<vmem>>, vector<1x8x32xf32>,
    %99 = vector.extract_strided_slice %16 {offsets = [4, 0, 0], sizes = [1, 8, 128], strides = [1, 1, 1]} : vector<8x8x128xf32> to vector<1x8x128xf32>
    %100 = vector.shape_cast %99 : vector<1x8x128xf32> to vector<8x128xf32>
    %cst_29 = arith.constant dense<0.000000e+00> : vector<8x128xf32>
    %101 = tpu.matmul %95, %9, %cst_29 {dimension_numbers = #tpu.dot_dimension_numbers<[1], [0], [0], [1], [0, 0, 1, 1], [], []>} : vector<8x32xf32>, vector<32x128xf32>, vector<8x128xf32> -> vector<8x128xf32>
    %102 = arith.addf %100, %101 : vector<8x128xf32>
    %103 = arith.mulf %102, %3 : vector<8x128xf32>
    %104 = math.tanh %103 : vector<8x128xf32>
    %105 = arith.mulf %104, %3 : vector<8x128xf32>
    %106 = arith.addf %105, %7 : vector<8x128xf32>
    %107 = vector.extract_strided_slice %106 {offsets = [0, 0], sizes = [8, 32], strides = [1, 1]} : vector<8x128xf32> to vector<8x32xf32>
    %108 = vector.extract_strided_slice %106 {offsets = [0, 32], sizes = [8, 32], strides = [1, 1]} : vector<8x128xf32> to vector<8x32xf32>
    %109 = vector.extract_strided_slice %106 {offsets = [0, 64], sizes = [8, 32], strides = [1, 1]} : vector<8x128xf32> to vector<8x32xf32>
    %110 = vector.extract_strided_slice %106 {offsets = [0, 96], sizes = [8, 32], strides = [1, 1]} : vector<8x128xf32> to vector<8x32xf32>
    %111 = arith.mulf %108, %93 : vector<8x32xf32>
    %112 = arith.mulf %107, %109 : vector<8x32xf32>
    %113 = arith.addf %111, %112 : vector<8x32xf32>
    %114 = math.tanh %113 : vector<8x32xf32>
    %115 = arith.mulf %110, %114 : vector<8x32xf32>
    %c4 = arith.constant 4 : index
    %c0_30 = arith.constant 0 : index
    %c0_31 = arith.constant 0 : index
    %116 = vector.load %arg16[%c4, %c0_30, %c0_31] : memref<8x8x32xf32, #tpu.memory_space<vmem>>, vector<1x8x32xf32>
    %117 = vector.shape_cast %116 : vector<1x8x32xf32> to vector<8x32xf32>
    %118 = vector.shape_cast %115 : vector<8x32xf32> to vector<1x8x32xf32>
    tpu.vector_store %arg16[%c4, %c0_30, %c0_31], %118 {strides = array<i32>} : memref<8x8x32xf32, #tpu.memory_space<vmem>>, vector<1x8x32xf32>,
    %119 = vector.extract_strided_slice %16 {offsets = [5, 0, 0], sizes = [1, 8, 128], strides = [1, 1, 1]} : vector<8x8x128xf32> to vector<1x8x128xf32>
    %120 = vector.shape_cast %119 : vector<1x8x128xf32> to vector<8x128xf32>
    %cst_32 = arith.constant dense<0.000000e+00> : vector<8x128xf32>
    %121 = tpu.matmul %115, %9, %cst_32 {dimension_numbers = #tpu.dot_dimension_numbers<[1], [0], [0], [1], [0, 0, 1, 1], [], []>} : vector<8x32xf32>, vector<32x128xf32>, vector<8x128xf32> -> vector<8x128xf32>
    %122 = arith.addf %120, %121 : vector<8x128xf32>
    %123 = arith.mulf %122, %3 : vector<8x128xf32>
    %124 = math.tanh %123 : vector<8x128xf32>
    %125 = arith.mulf %124, %3 : vector<8x128xf32>
    %126 = arith.addf %125, %7 : vector<8x128xf32>
    %127 = vector.extract_strided_slice %126 {offsets = [0, 0], sizes = [8, 32], strides = [1, 1]} : vector<8x128xf32> to vector<8x32xf32>
    %128 = vector.extract_strided_slice %126 {offsets = [0, 32], sizes = [8, 32], strides = [1, 1]} : vector<8x128xf32> to vector<8x32xf32>
    %129 = vector.extract_strided_slice %126 {offsets = [0, 64], sizes = [8, 32], strides = [1, 1]} : vector<8x128xf32> to vector<8x32xf32>
    %130 = vector.extract_strided_slice %126 {offsets = [0, 96], sizes = [8, 32], strides = [1, 1]} : vector<8x128xf32> to vector<8x32xf32>
    %131 = arith.mulf %128, %113 : vector<8x32xf32>
    %132 = arith.mulf %127, %129 : vector<8x32xf32>
    %133 = arith.addf %131, %132 : vector<8x32xf32>
    %134 = math.tanh %133 : vector<8x32xf32>
    %135 = arith.mulf %130, %134 : vector<8x32xf32>
    %c5 = arith.constant 5 : index
    %c0_33 = arith.constant 0 : index
    %c0_34 = arith.constant 0 : index
    %136 = vector.load %arg16[%c5, %c0_33, %c0_34] : memref<8x8x32xf32, #tpu.memory_space<vmem>>, vector<1x8x32xf32>
    %137 = vector.shape_cast %136 : vector<1x8x32xf32> to vector<8x32xf32>
    %138 = vector.shape_cast %135 : vector<8x32xf32> to vector<1x8x32xf32>
    tpu.vector_store %arg16[%c5, %c0_33, %c0_34], %138 {strides = array<i32>} : memref<8x8x32xf32, #tpu.memory_space<vmem>>, vector<1x8x32xf32>,
    %139 = vector.extract_strided_slice %16 {offsets = [6, 0, 0], sizes = [1, 8, 128], strides = [1, 1, 1]} : vector<8x8x128xf32> to vector<1x8x128xf32>
    %140 = vector.shape_cast %139 : vector<1x8x128xf32> to vector<8x128xf32>
    %cst_35 = arith.constant dense<0.000000e+00> : vector<8x128xf32>
    %141 = tpu.matmul %135, %9, %cst_35 {dimension_numbers = #tpu.dot_dimension_numbers<[1], [0], [0], [1], [0, 0, 1, 1], [], []>} : vector<8x32xf32>, vector<32x128xf32>, vector<8x128xf32> -> vector<8x128xf32>
    %142 = arith.addf %140, %141 : vector<8x128xf32>
    %143 = arith.mulf %142, %3 : vector<8x128xf32>
    %144 = math.tanh %143 : vector<8x128xf32>
    %145 = arith.mulf %144, %3 : vector<8x128xf32>
    %146 = arith.addf %145, %7 : vector<8x128xf32>
    %147 = vector.extract_strided_slice %146 {offsets = [0, 0], sizes = [8, 32], strides = [1, 1]} : vector<8x128xf32> to vector<8x32xf32>
    %148 = vector.extract_strided_slice %146 {offsets = [0, 32], sizes = [8, 32], strides = [1, 1]} : vector<8x128xf32> to vector<8x32xf32>
    %149 = vector.extract_strided_slice %146 {offsets = [0, 64], sizes = [8, 32], strides = [1, 1]} : vector<8x128xf32> to vector<8x32xf32>
    %150 = vector.extract_strided_slice %146 {offsets = [0, 96], sizes = [8, 32], strides = [1, 1]} : vector<8x128xf32> to vector<8x32xf32>
    %151 = arith.mulf %148, %133 : vector<8x32xf32>
    %152 = arith.mulf %147, %149 : vector<8x32xf32>
    %153 = arith.addf %151, %152 : vector<8x32xf32>
    %154 = math.tanh %153 : vector<8x32xf32>
    %155 = arith.mulf %150, %154 : vector<8x32xf32>
    %c6 = arith.constant 6 : index
    %c0_36 = arith.constant 0 : index
    %c0_37 = arith.constant 0 : index
    %156 = vector.load %arg16[%c6, %c0_36, %c0_37] : memref<8x8x32xf32, #tpu.memory_space<vmem>>, vector<1x8x32xf32>
    %157 = vector.shape_cast %156 : vector<1x8x32xf32> to vector<8x32xf32>
    %158 = vector.shape_cast %155 : vector<8x32xf32> to vector<1x8x32xf32>
    tpu.vector_store %arg16[%c6, %c0_36, %c0_37], %158 {strides = array<i32>} : memref<8x8x32xf32, #tpu.memory_space<vmem>>, vector<1x8x32xf32>,
    %159 = vector.extract_strided_slice %16 {offsets = [7, 0, 0], sizes = [1, 8, 128], strides = [1, 1, 1]} : vector<8x8x128xf32> to vector<1x8x128xf32>
    %160 = vector.shape_cast %159 : vector<1x8x128xf32> to vector<8x128xf32>
    %cst_38 = arith.constant dense<0.000000e+00> : vector<8x128xf32>
    %161 = tpu.matmul %155, %9, %cst_38 {dimension_numbers = #tpu.dot_dimension_numbers<[1], [0], [0], [1], [0, 0, 1, 1], [], []>} : vector<8x32xf32>, vector<32x128xf32>, vector<8x128xf32> -> vector<8x128xf32>
    %162 = arith.addf %160, %161 : vector<8x128xf32>
    %163 = arith.mulf %162, %3 : vector<8x128xf32>
    %164 = math.tanh %163 : vector<8x128xf32>
    %165 = arith.mulf %164, %3 : vector<8x128xf32>
    %166 = arith.addf %165, %7 : vector<8x128xf32>
    %167 = vector.extract_strided_slice %166 {offsets = [0, 0], sizes = [8, 32], strides = [1, 1]} : vector<8x128xf32> to vector<8x32xf32>
    %168 = vector.extract_strided_slice %166 {offsets = [0, 32], sizes = [8, 32], strides = [1, 1]} : vector<8x128xf32> to vector<8x32xf32>
    %169 = vector.extract_strided_slice %166 {offsets = [0, 64], sizes = [8, 32], strides = [1, 1]} : vector<8x128xf32> to vector<8x32xf32>
    %170 = vector.extract_strided_slice %166 {offsets = [0, 96], sizes = [8, 32], strides = [1, 1]} : vector<8x128xf32> to vector<8x32xf32>
    %171 = arith.mulf %168, %153 : vector<8x32xf32>
    %172 = arith.mulf %167, %169 : vector<8x32xf32>
    %173 = arith.addf %171, %172 : vector<8x32xf32>
    %174 = math.tanh %173 : vector<8x32xf32>
    %175 = arith.mulf %170, %174 : vector<8x32xf32>
    %c7 = arith.constant 7 : index
    %c0_39 = arith.constant 0 : index
    %c0_40 = arith.constant 0 : index
    %176 = vector.load %arg16[%c7, %c0_39, %c0_40] : memref<8x8x32xf32, #tpu.memory_space<vmem>>, vector<1x8x32xf32>
    %177 = vector.shape_cast %176 : vector<1x8x32xf32> to vector<8x32xf32>
    %178 = vector.shape_cast %175 : vector<8x32xf32> to vector<1x8x32xf32>
    tpu.vector_store %arg16[%c7, %c0_39, %c0_40], %178 {strides = array<i32>} : memref<8x8x32xf32, #tpu.memory_space<vmem>>, vector<1x8x32xf32>,
    %c0_41 = arith.constant 0 : index
    %c0_42 = arith.constant 0 : index
    %179 = vector.load %arg5[%c0_41, %c0_42] : memref<32x128xf32, #tpu.memory_space<vmem>>, vector<32x128xf32>
    %c0_43 = arith.constant 0 : index
    %c0_44 = arith.constant 0 : index
    %180 = vector.load %arg6[%c0_43, %c0_44] : memref<32x128xf32, #tpu.memory_space<vmem>>, vector<32x128xf32>
    %c0_45 = arith.constant 0 : index
    %c0_46 = arith.constant 0 : index
    %181 = vector.load %arg7[%c0_45, %c0_46] : memref<1x128xf32, #tpu.memory_space<vmem>>, vector<1x128xf32>
    %c0_47 = arith.constant 0 : index
    %c0_48 = arith.constant 0 : index
    %c0_49 = arith.constant 0 : index
    %182 = vector.load %arg16[%c0_47, %c0_48, %c0_49] : memref<8x8x32xf32, #tpu.memory_space<vmem>>, vector<8x8x32xf32>
    %183 = vector.shape_cast %182 : vector<8x8x32xf32> to vector<64x32xf32>
    %cst_50 = arith.constant dense<0.000000e+00> : vector<64x128xf32>
    %184 = tpu.matmul %183, %179, %cst_50 {dimension_numbers = #tpu.dot_dimension_numbers<[1], [0], [0], [1], [0, 0, 1, 1], [], []>} : vector<64x32xf32>, vector<32x128xf32>, vector<64x128xf32> -> vector<64x128xf32>
    %185 = vector.broadcast %181 : vector<1x128xf32> to vector<64x128xf32>
    %186 = arith.addf %184, %185 : vector<64x128xf32>
    %187 = vector.shape_cast %186 : vector<64x128xf32> to vector<8x8x128xf32>
    %cst_51 = arith.constant 0.000000e+00 : f32
    %188 = vector.broadcast %cst_51 : f32 to vector<8x32xf32>
    %cst_52 = arith.constant 0.000000e+00 : f32
    %189 = vector.broadcast %cst_52 : f32 to vector<8x32xf32>
    %190 = vector.extract_strided_slice %187 {offsets = [0, 0, 0], sizes = [1, 8, 128], strides = [1, 1, 1]} : vector<8x8x128xf32> to vector<1x8x128xf32>
    %191 = vector.shape_cast %190 : vector<1x8x128xf32> to vector<8x128xf32>
    %cst_53 = arith.constant dense<0.000000e+00> : vector<8x128xf32>
    %192 = tpu.matmul %188, %180, %cst_53 {dimension_numbers = #tpu.dot_dimension_numbers<[1], [0], [0], [1], [0, 0, 1, 1], [], []>} : vector<8x32xf32>, vector<32x128xf32>, vector<8x128xf32> -> vector<8x128xf32>
    %193 = arith.addf %191, %192 : vector<8x128xf32>
    %194 = arith.mulf %193, %3 : vector<8x128xf32>
    %195 = math.tanh %194 : vector<8x128xf32>
    %196 = arith.mulf %195, %3 : vector<8x128xf32>
    %197 = arith.addf %196, %7 : vector<8x128xf32>
    %198 = vector.extract_strided_slice %197 {offsets = [0, 0], sizes = [8, 32], strides = [1, 1]} : vector<8x128xf32> to vector<8x32xf32>
    %199 = vector.extract_strided_slice %197 {offsets = [0, 32], sizes = [8, 32], strides = [1, 1]} : vector<8x128xf32> to vector<8x32xf32>
    %200 = vector.extract_strided_slice %197 {offsets = [0, 64], sizes = [8, 32], strides = [1, 1]} : vector<8x128xf32> to vector<8x32xf32>
    %201 = vector.extract_strided_slice %197 {offsets = [0, 96], sizes = [8, 32], strides = [1, 1]} : vector<8x128xf32> to vector<8x32xf32>
    %202 = arith.mulf %199, %189 : vector<8x32xf32>
    %203 = arith.mulf %198, %200 : vector<8x32xf32>
    %204 = arith.addf %202, %203 : vector<8x32xf32>
    %205 = math.tanh %204 : vector<8x32xf32>
    %206 = arith.mulf %201, %205 : vector<8x32xf32>
    %207 = vector.extract_strided_slice %187 {offsets = [1, 0, 0], sizes = [1, 8, 128], strides = [1, 1, 1]} : vector<8x8x128xf32> to vector<1x8x128xf32>
    %208 = vector.shape_cast %207 : vector<1x8x128xf32> to vector<8x128xf32>
    %cst_54 = arith.constant dense<0.000000e+00> : vector<8x128xf32>
    %209 = tpu.matmul %206, %180, %cst_54 {dimension_numbers = #tpu.dot_dimension_numbers<[1], [0], [0], [1], [0, 0, 1, 1], [], []>} : vector<8x32xf32>, vector<32x128xf32>, vector<8x128xf32> -> vector<8x128xf32>
    %210 = arith.addf %208, %209 : vector<8x128xf32>
    %211 = arith.mulf %210, %3 : vector<8x128xf32>
    %212 = math.tanh %211 : vector<8x128xf32>
    %213 = arith.mulf %212, %3 : vector<8x128xf32>
    %214 = arith.addf %213, %7 : vector<8x128xf32>
    %215 = vector.extract_strided_slice %214 {offsets = [0, 0], sizes = [8, 32], strides = [1, 1]} : vector<8x128xf32> to vector<8x32xf32>
    %216 = vector.extract_strided_slice %214 {offsets = [0, 32], sizes = [8, 32], strides = [1, 1]} : vector<8x128xf32> to vector<8x32xf32>
    %217 = vector.extract_strided_slice %214 {offsets = [0, 64], sizes = [8, 32], strides = [1, 1]} : vector<8x128xf32> to vector<8x32xf32>
    %218 = vector.extract_strided_slice %214 {offsets = [0, 96], sizes = [8, 32], strides = [1, 1]} : vector<8x128xf32> to vector<8x32xf32>
    %219 = arith.mulf %216, %204 : vector<8x32xf32>
    %220 = arith.mulf %215, %217 : vector<8x32xf32>
    %221 = arith.addf %219, %220 : vector<8x32xf32>
    %222 = math.tanh %221 : vector<8x32xf32>
    %223 = arith.mulf %218, %222 : vector<8x32xf32>
    %224 = vector.extract_strided_slice %187 {offsets = [2, 0, 0], sizes = [1, 8, 128], strides = [1, 1, 1]} : vector<8x8x128xf32> to vector<1x8x128xf32>
    %225 = vector.shape_cast %224 : vector<1x8x128xf32> to vector<8x128xf32>
    %cst_55 = arith.constant dense<0.000000e+00> : vector<8x128xf32>
    %226 = tpu.matmul %223, %180, %cst_55 {dimension_numbers = #tpu.dot_dimension_numbers<[1], [0], [0], [1], [0, 0, 1, 1], [], []>} : vector<8x32xf32>, vector<32x128xf32>, vector<8x128xf32> -> vector<8x128xf32>
    %227 = arith.addf %225, %226 : vector<8x128xf32>
    %228 = arith.mulf %227, %3 : vector<8x128xf32>
    %229 = math.tanh %228 : vector<8x128xf32>
    %230 = arith.mulf %229, %3 : vector<8x128xf32>
    %231 = arith.addf %230, %7 : vector<8x128xf32>
    %232 = vector.extract_strided_slice %231 {offsets = [0, 0], sizes = [8, 32], strides = [1, 1]} : vector<8x128xf32> to vector<8x32xf32>
    %233 = vector.extract_strided_slice %231 {offsets = [0, 32], sizes = [8, 32], strides = [1, 1]} : vector<8x128xf32> to vector<8x32xf32>
    %234 = vector.extract_strided_slice %231 {offsets = [0, 64], sizes = [8, 32], strides = [1, 1]} : vector<8x128xf32> to vector<8x32xf32>
    %235 = vector.extract_strided_slice %231 {offsets = [0, 96], sizes = [8, 32], strides = [1, 1]} : vector<8x128xf32> to vector<8x32xf32>
    %236 = arith.mulf %233, %221 : vector<8x32xf32>
    %237 = arith.mulf %232, %234 : vector<8x32xf32>
    %238 = arith.addf %236, %237 : vector<8x32xf32>
    %239 = math.tanh %238 : vector<8x32xf32>
    %240 = arith.mulf %235, %239 : vector<8x32xf32>
    %241 = vector.extract_strided_slice %187 {offsets = [3, 0, 0], sizes = [1, 8, 128], strides = [1, 1, 1]} : vector<8x8x128xf32> to vector<1x8x128xf32>
    %242 = vector.shape_cast %241 : vector<1x8x128xf32> to vector<8x128xf32>
    %cst_56 = arith.constant dense<0.000000e+00> : vector<8x128xf32>
    %243 = tpu.matmul %240, %180, %cst_56 {dimension_numbers = #tpu.dot_dimension_numbers<[1], [0], [0], [1], [0, 0, 1, 1], [], []>} : vector<8x32xf32>, vector<32x128xf32>, vector<8x128xf32> -> vector<8x128xf32>
    %244 = arith.addf %242, %243 : vector<8x128xf32>
    %245 = arith.mulf %244, %3 : vector<8x128xf32>
    %246 = math.tanh %245 : vector<8x128xf32>
    %247 = arith.mulf %246, %3 : vector<8x128xf32>
    %248 = arith.addf %247, %7 : vector<8x128xf32>
    %249 = vector.extract_strided_slice %248 {offsets = [0, 0], sizes = [8, 32], strides = [1, 1]} : vector<8x128xf32> to vector<8x32xf32>
    %250 = vector.extract_strided_slice %248 {offsets = [0, 32], sizes = [8, 32], strides = [1, 1]} : vector<8x128xf32> to vector<8x32xf32>
    %251 = vector.extract_strided_slice %248 {offsets = [0, 64], sizes = [8, 32], strides = [1, 1]} : vector<8x128xf32> to vector<8x32xf32>
    %252 = vector.extract_strided_slice %248 {offsets = [0, 96], sizes = [8, 32], strides = [1, 1]} : vector<8x128xf32> to vector<8x32xf32>
    %253 = arith.mulf %250, %238 : vector<8x32xf32>
    %254 = arith.mulf %249, %251 : vector<8x32xf32>
    %255 = arith.addf %253, %254 : vector<8x32xf32>
    %256 = math.tanh %255 : vector<8x32xf32>
    %257 = arith.mulf %252, %256 : vector<8x32xf32>
    %258 = vector.extract_strided_slice %187 {offsets = [4, 0, 0], sizes = [1, 8, 128], strides = [1, 1, 1]} : vector<8x8x128xf32> to vector<1x8x128xf32>
    %259 = vector.shape_cast %258 : vector<1x8x128xf32> to vector<8x128xf32>
    %cst_57 = arith.constant dense<0.000000e+00> : vector<8x128xf32>
    %260 = tpu.matmul %257, %180, %cst_57 {dimension_numbers = #tpu.dot_dimension_numbers<[1], [0], [0], [1], [0, 0, 1, 1], [], []>} : vector<8x32xf32>, vector<32x128xf32>, vector<8x128xf32> -> vector<8x128xf32>
    %261 = arith.addf %259, %260 : vector<8x128xf32>
    %262 = arith.mulf %261, %3 : vector<8x128xf32>
    %263 = math.tanh %262 : vector<8x128xf32>
    %264 = arith.mulf %263, %3 : vector<8x128xf32>
    %265 = arith.addf %264, %7 : vector<8x128xf32>
    %266 = vector.extract_strided_slice %265 {offsets = [0, 0], sizes = [8, 32], strides = [1, 1]} : vector<8x128xf32> to vector<8x32xf32>
    %267 = vector.extract_strided_slice %265 {offsets = [0, 32], sizes = [8, 32], strides = [1, 1]} : vector<8x128xf32> to vector<8x32xf32>
    %268 = vector.extract_strided_slice %265 {offsets = [0, 64], sizes = [8, 32], strides = [1, 1]} : vector<8x128xf32> to vector<8x32xf32>
    %269 = vector.extract_strided_slice %265 {offsets = [0, 96], sizes = [8, 32], strides = [1, 1]} : vector<8x128xf32> to vector<8x32xf32>
    %270 = arith.mulf %267, %255 : vector<8x32xf32>
    %271 = arith.mulf %266, %268 : vector<8x32xf32>
    %272 = arith.addf %270, %271 : vector<8x32xf32>
    %273 = math.tanh %272 : vector<8x32xf32>
    %274 = arith.mulf %269, %273 : vector<8x32xf32>
    %275 = vector.extract_strided_slice %187 {offsets = [5, 0, 0], sizes = [1, 8, 128], strides = [1, 1, 1]} : vector<8x8x128xf32> to vector<1x8x128xf32>
    %276 = vector.shape_cast %275 : vector<1x8x128xf32> to vector<8x128xf32>
    %cst_58 = arith.constant dense<0.000000e+00> : vector<8x128xf32>
    %277 = tpu.matmul %274, %180, %cst_58 {dimension_numbers = #tpu.dot_dimension_numbers<[1], [0], [0], [1], [0, 0, 1, 1], [], []>} : vector<8x32xf32>, vector<32x128xf32>, vector<8x128xf32> -> vector<8x128xf32>
    %278 = arith.addf %276, %277 : vector<8x128xf32>
    %279 = arith.mulf %278, %3 : vector<8x128xf32>
    %280 = math.tanh %279 : vector<8x128xf32>
    %281 = arith.mulf %280, %3 : vector<8x128xf32>
    %282 = arith.addf %281, %7 : vector<8x128xf32>
    %283 = vector.extract_strided_slice %282 {offsets = [0, 0], sizes = [8, 32], strides = [1, 1]} : vector<8x128xf32> to vector<8x32xf32>
    %284 = vector.extract_strided_slice %282 {offsets = [0, 32], sizes = [8, 32], strides = [1, 1]} : vector<8x128xf32> to vector<8x32xf32>
    %285 = vector.extract_strided_slice %282 {offsets = [0, 64], sizes = [8, 32], strides = [1, 1]} : vector<8x128xf32> to vector<8x32xf32>
    %286 = vector.extract_strided_slice %282 {offsets = [0, 96], sizes = [8, 32], strides = [1, 1]} : vector<8x128xf32> to vector<8x32xf32>
    %287 = arith.mulf %284, %272 : vector<8x32xf32>
    %288 = arith.mulf %283, %285 : vector<8x32xf32>
    %289 = arith.addf %287, %288 : vector<8x32xf32>
    %290 = math.tanh %289 : vector<8x32xf32>
    %291 = arith.mulf %286, %290 : vector<8x32xf32>
    %292 = vector.extract_strided_slice %187 {offsets = [6, 0, 0], sizes = [1, 8, 128], strides = [1, 1, 1]} : vector<8x8x128xf32> to vector<1x8x128xf32>
    %293 = vector.shape_cast %292 : vector<1x8x128xf32> to vector<8x128xf32>
    %cst_59 = arith.constant dense<0.000000e+00> : vector<8x128xf32>
    %294 = tpu.matmul %291, %180, %cst_59 {dimension_numbers = #tpu.dot_dimension_numbers<[1], [0], [0], [1], [0, 0, 1, 1], [], []>} : vector<8x32xf32>, vector<32x128xf32>, vector<8x128xf32> -> vector<8x128xf32>
    %295 = arith.addf %293, %294 : vector<8x128xf32>
    %296 = arith.mulf %295, %3 : vector<8x128xf32>
    %297 = math.tanh %296 : vector<8x128xf32>
    %298 = arith.mulf %297, %3 : vector<8x128xf32>
    %299 = arith.addf %298, %7 : vector<8x128xf32>
    %300 = vector.extract_strided_slice %299 {offsets = [0, 0], sizes = [8, 32], strides = [1, 1]} : vector<8x128xf32> to vector<8x32xf32>
    %301 = vector.extract_strided_slice %299 {offsets = [0, 32], sizes = [8, 32], strides = [1, 1]} : vector<8x128xf32> to vector<8x32xf32>
    %302 = vector.extract_strided_slice %299 {offsets = [0, 64], sizes = [8, 32], strides = [1, 1]} : vector<8x128xf32> to vector<8x32xf32>
    %303 = vector.extract_strided_slice %299 {offsets = [0, 96], sizes = [8, 32], strides = [1, 1]} : vector<8x128xf32> to vector<8x32xf32>
    %304 = arith.mulf %301, %289 : vector<8x32xf32>
    %305 = arith.mulf %300, %302 : vector<8x32xf32>
    %306 = arith.addf %304, %305 : vector<8x32xf32>
    %307 = math.tanh %306 : vector<8x32xf32>
    %308 = arith.mulf %303, %307 : vector<8x32xf32>
    %309 = vector.extract_strided_slice %187 {offsets = [7, 0, 0], sizes = [1, 8, 128], strides = [1, 1, 1]} : vector<8x8x128xf32> to vector<1x8x128xf32>
    %310 = vector.shape_cast %309 : vector<1x8x128xf32> to vector<8x128xf32>
    %cst_60 = arith.constant dense<0.000000e+00> : vector<8x128xf32>
    %311 = tpu.matmul %308, %180, %cst_60 {dimension_numbers = #tpu.dot_dimension_numbers<[1], [0], [0], [1], [0, 0, 1, 1], [], []>} : vector<8x32xf32>, vector<32x128xf32>, vector<8x128xf32> -> vector<8x128xf32>
    %312 = arith.addf %310, %311 : vector<8x128xf32>
    %313 = arith.mulf %312, %3 : vector<8x128xf32>
    %314 = math.tanh %313 : vector<8x128xf32>
    %315 = arith.mulf %314, %3 : vector<8x128xf32>
    %316 = arith.addf %315, %7 : vector<8x128xf32>
    %317 = vector.extract_strided_slice %316 {offsets = [0, 0], sizes = [8, 32], strides = [1, 1]} : vector<8x128xf32> to vector<8x32xf32>
    %318 = vector.extract_strided_slice %316 {offsets = [0, 32], sizes = [8, 32], strides = [1, 1]} : vector<8x128xf32> to vector<8x32xf32>
    %319 = vector.extract_strided_slice %316 {offsets = [0, 64], sizes = [8, 32], strides = [1, 1]} : vector<8x128xf32> to vector<8x32xf32>
    %320 = vector.extract_strided_slice %316 {offsets = [0, 96], sizes = [8, 32], strides = [1, 1]} : vector<8x128xf32> to vector<8x32xf32>
    %321 = arith.mulf %318, %306 : vector<8x32xf32>
    %322 = arith.mulf %317, %319 : vector<8x32xf32>
    %323 = arith.addf %321, %322 : vector<8x32xf32>
    %324 = math.tanh %323 : vector<8x32xf32>
    %325 = arith.mulf %320, %324 : vector<8x32xf32>
    %c0_61 = arith.constant 0 : index
    %c0_62 = arith.constant 0 : index
    %326 = vector.load %arg8[%c0_61, %c0_62] : memref<32x32xf32, #tpu.memory_space<vmem>>, vector<32x32xf32>
    %cst_63 = arith.constant dense<0.000000e+00> : vector<8x32xf32>
    %327 = tpu.matmul %325, %326, %cst_63 {dimension_numbers = #tpu.dot_dimension_numbers<[1], [0], [0], [1], [0, 0, 1, 1], [], []>} : vector<8x32xf32>, vector<32x32xf32>, vector<8x32xf32> -> vector<8x32xf32>
    %c0_64 = arith.constant 0 : index
    %c0_65 = arith.constant 0 : index
    %328 = vector.load %arg9[%c0_64, %c0_65] : memref<1x32xf32, #tpu.memory_space<vmem>>, vector<1x32xf32>
    %329 = vector.broadcast %328 : vector<1x32xf32> to vector<8x32xf32>
    %330 = arith.addf %327, %329 : vector<8x32xf32>
    %331 = math.tanh %330 : vector<8x32xf32>
    %c0_66 = arith.constant 0 : index
    %c0_67 = arith.constant 0 : index
    %332 = vector.load %arg10[%c0_66, %c0_67] : memref<32x64xf32, #tpu.memory_space<vmem>>, vector<32x64xf32>
    %cst_68 = arith.constant dense<0.000000e+00> : vector<8x64xf32>
    %333 = tpu.matmul %331, %332, %cst_68 {dimension_numbers = #tpu.dot_dimension_numbers<[1], [0], [0], [1], [0, 0, 1, 1], [], []>} : vector<8x32xf32>, vector<32x64xf32>, vector<8x64xf32> -> vector<8x64xf32>
    %c0_69 = arith.constant 0 : index
    %c0_70 = arith.constant 0 : index
    %334 = vector.load %arg11[%c0_69, %c0_70] : memref<1x64xf32, #tpu.memory_space<vmem>>, vector<1x64xf32>
    %335 = vector.broadcast %334 : vector<1x64xf32> to vector<8x64xf32>
    %336 = arith.addf %333, %335 : vector<8x64xf32>
    %337 = vector.extract_strided_slice %336 {offsets = [0, 0], sizes = [8, 32], strides = [1, 1]} : vector<8x64xf32> to vector<8x32xf32>
    %338 = vector.extract_strided_slice %336 {offsets = [0, 32], sizes = [8, 32], strides = [1, 1]} : vector<8x64xf32> to vector<8x32xf32>
    %c0_71 = arith.constant 0 : index
    %c0_72 = arith.constant 0 : index
    %339 = vector.load %arg14[%c0_71, %c0_72] : memref<8x32xf32, #tpu.memory_space<vmem>>, vector<8x32xf32>
    %cst_73 = arith.constant 5.000000e-01 : f32
    %340 = vector.broadcast %cst_73 : f32 to vector<8x32xf32>
    %341 = arith.mulf %340, %338 : vector<8x32xf32>
    %342 = math.exp %341 : vector<8x32xf32>
    %343 = arith.mulf %339, %342 : vector<8x32xf32>
    %344 = arith.addf %337, %343 : vector<8x32xf32>
    %cst_74 = arith.constant 1.000000e+00 : f32
    %345 = vector.broadcast %cst_74 : f32 to vector<8x32xf32>
    %346 = arith.addf %345, %344 : vector<8x32xf32>
    %347 = arith.mulf %331, %346 : vector<8x32xf32>
    %c0_75 = arith.constant 0 : index
    %c0_76 = arith.constant 0 : index
    %348 = vector.load %arg12[%c0_75, %c0_76] : memref<32x16xf32, #tpu.memory_space<vmem>>, vector<32x16xf32>
    %cst_77 = arith.constant dense<0.000000e+00> : vector<8x16xf32>
    %349 = tpu.matmul %347, %348, %cst_77 {dimension_numbers = #tpu.dot_dimension_numbers<[1], [0], [0], [1], [0, 0, 1, 1], [], []>} : vector<8x32xf32>, vector<32x16xf32>, vector<8x16xf32> -> vector<8x16xf32>
    %c0_78 = arith.constant 0 : index
    %c0_79 = arith.constant 0 : index
    %350 = vector.load %arg13[%c0_78, %c0_79] : memref<1x16xf32, #tpu.memory_space<vmem>>, vector<1x16xf32>
    %351 = vector.broadcast %350 : vector<1x16xf32> to vector<8x16xf32>
    %352 = arith.addf %349, %351 : vector<8x16xf32>
    %cst_80 = arith.constant 0.000000e+00 : f32
    %353 = vector.broadcast %cst_80 : f32 to vector<8x48xf32>
    %354 = tpu.concatenate %352, %337, %338, %353 in 1 : vector<8x16xf32>, vector<8x32xf32>, vector<8x32xf32>, vector<8x48xf32> -> vector<8x128xf32>
    %c0_81 = arith.constant 0 : index
    %c0_82 = arith.constant 0 : index
    %355 = vector.load %arg15[%c0_81, %c0_82] : memref<8x128xf32, #tpu.memory_space<vmem>>, vector<8x128xf32>
    tpu.vector_store %arg15[%c0_81, %c0_82], %354 {strides = array<i32>} : memref<8x128xf32, #tpu.memory_space<vmem>>, vector<8x128xf32>,
    return
  }
  func.func @transform_0(%arg0: i32) -> (i32, i32, i32) {
    %c0_i32 = arith.constant 0 : i32
    %c0_i32_0 = arith.constant 0 : i32
    %c0_i32_1 = arith.constant 0 : i32
    return %c0_i32, %arg0, %c0_i32_0 : i32, i32, i32
  }
  func.func @transform_1(%arg0: i32) -> (i32, i32) {
    %c0_i32 = arith.constant 0 : i32
    %c0_i32_0 = arith.constant 0 : i32
    %c0_i32_1 = arith.constant 0 : i32
    return %c0_i32, %c0_i32_0 : i32, i32
  }
  func.func @transform_2(%arg0: i32) -> (i32, i32) {
    %c0_i32 = arith.constant 0 : i32
    %c0_i32_0 = arith.constant 0 : i32
    %c0_i32_1 = arith.constant 0 : i32
    return %c0_i32, %c0_i32_0 : i32, i32
  }
  func.func @transform_3(%arg0: i32) -> (i32, i32) {
    %c0_i32 = arith.constant 0 : i32
    %c0_i32_0 = arith.constant 0 : i32
    %c0_i32_1 = arith.constant 0 : i32
    return %c0_i32, %c0_i32_0 : i32, i32
  }
  func.func @transform_4(%arg0: i32) -> (i32, i32) {
    %c0_i32 = arith.constant 0 : i32
    %c0_i32_0 = arith.constant 0 : i32
    %c0_i32_1 = arith.constant 0 : i32
    return %c0_i32, %c0_i32_0 : i32, i32
  }
  func.func @transform_5(%arg0: i32) -> (i32, i32) {
    %c0_i32 = arith.constant 0 : i32
    %c0_i32_0 = arith.constant 0 : i32
    %c0_i32_1 = arith.constant 0 : i32
    return %c0_i32, %c0_i32_0 : i32, i32
  }
  func.func @transform_6(%arg0: i32) -> (i32, i32) {
    %c0_i32 = arith.constant 0 : i32
    %c0_i32_0 = arith.constant 0 : i32
    %c0_i32_1 = arith.constant 0 : i32
    return %c0_i32, %c0_i32_0 : i32, i32
  }
  func.func @transform_7(%arg0: i32) -> (i32, i32) {
    %c0_i32 = arith.constant 0 : i32
    %c0_i32_0 = arith.constant 0 : i32
    %c0_i32_1 = arith.constant 0 : i32
    return %c0_i32, %c0_i32_0 : i32, i32
  }
  func.func @transform_8(%arg0: i32) -> (i32, i32) {
    %c0_i32 = arith.constant 0 : i32
    %c0_i32_0 = arith.constant 0 : i32
    %c0_i32_1 = arith.constant 0 : i32
    return %c0_i32, %c0_i32_0 : i32, i32
  }
  func.func @transform_9(%arg0: i32) -> (i32, i32) {
    %c0_i32 = arith.constant 0 : i32
    %c0_i32_0 = arith.constant 0 : i32
    %c0_i32_1 = arith.constant 0 : i32
    return %c0_i32, %c0_i32_0 : i32, i32
  }
  func.func @transform_10(%arg0: i32) -> (i32, i32) {
    %c0_i32 = arith.constant 0 : i32
    %c0_i32_0 = arith.constant 0 : i32
    %c0_i32_1 = arith.constant 0 : i32
    return %c0_i32, %c0_i32_0 : i32, i32
  }
  func.func @transform_11(%arg0: i32) -> (i32, i32) {
    %c0_i32 = arith.constant 0 : i32
    %c0_i32_0 = arith.constant 0 : i32
    %c0_i32_1 = arith.constant 0 : i32
    return %c0_i32, %c0_i32_0 : i32, i32
  }
  func.func @transform_12(%arg0: i32) -> (i32, i32) {
    %c0_i32 = arith.constant 0 : i32
    %c0_i32_0 = arith.constant 0 : i32
    %c0_i32_1 = arith.constant 0 : i32
    return %c0_i32, %c0_i32_0 : i32, i32
  }
  func.func @transform_13(%arg0: i32) -> (i32, i32) {
    %c0_i32 = arith.constant 0 : i32
    %c0_i32_0 = arith.constant 0 : i32
    return %arg0, %c0_i32 : i32, i32
  }
  func.func @transform_14(%arg0: i32) -> (i32, i32) {
    %c0_i32 = arith.constant 0 : i32
    %c0_i32_0 = arith.constant 0 : i32
    return %arg0, %c0_i32 : i32, i32
  }
}

</mosaic_0001>

<bundles_post_ra>
// kernel: lstm_vae_forward.1
= control target key start
LH: loop header
LB: loop body
LE: loop exit
PB: predicated region body
PF: predicated region fallthrough
CT: control target
= control target key end

     0   :  { %s3517_s29 = smov 0   ;;  %s3519_s30 = smov 0   ;;  %s4007_s0 = inlined_call_operand.vmem [shape: f32[8,16,6], index: 0, kind: input, shape index: {}]   ;;  %s4008_s1 = inlined_call_operand.vmem [shape: f32[6,128], index: 1, kind: input, shape index: {}]   ;;  %s4009_s2 = inlined_call_operand.vmem [shape: f32[32,128], index: 2, kind: input, shape index: {}]   ;;  %s4010_s3 = inlined_call_operand.vmem [shape: f32[1,128], index: 3, kind: input, shape index: {}]   ;;  %s4011_s4 = inlined_call_operand.vmem [shape: f32[32,128], index: 4, kind: input, shape index: {}]   ;;  %s4012_s5 = inlined_call_operand.vmem [shape: f32[32,128], index: 5, kind: input, shape index: {}]   ;;  %s4013_s6 = inlined_call_operand.vmem [shape: f32[1,128], index: 6, kind: input, shape index: {}]   ;;  %s4014_s7 = inlined_call_operand.vmem [shape: f32[32,32], index: 7, kind: input, shape index: {}]   ;;  %s4015_s8 = inlined_call_operand.vmem [shape: f32[1,32], index: 8, kind: input, shape index: {}]   ;;  %s4016_s9 = inlined_call_operand.vmem [shape: f32[32,64], index: 9, kind: input, shape index: {}]   ;;  %s4017_s10 = inlined_call_operand.vmem [shape: f32[1,64], index: 10, kind: input, shape index: {}]   ;;  %s4018_s11 = inlined_call_operand.vmem [shape: f32[32,16], index: 11, kind: input, shape index: {}]   ;;  %s4019_s12 = inlined_call_operand.vmem [shape: f32[1,16], index: 12, kind: input, shape index: {}]   ;;  %s4020_s13 = inlined_call_operand.vmem [shape: f32[16,32], index: 13, kind: input, shape index: {}]   ;;  %s4021_s14 = inlined_call_operand.vmem [shape: f32[16,128], index: 14, kind: output, shape index: {}]  }
   0x1   :  { %s3521_s15 = smov 0  }
   0x2 LB: > { %s2778_s16 = sadd.s32 4294967295, %s3432_s15   ;;  %s3534_s17 = sadd.s32 1, %s3432_s15   ;;  %s3432_s15 = sphi %s3521_s15, %s4024_s15   ;;  %s3428_s30 = sphi %s3519_s30, %s4023_s30   ;;  %s3424_s29 = sphi %s3517_s29, %s4022_s29  }
   0x3   : > { %s28_s18 = ssub.s32 %s3432_s15, %s3534_s17  ;;  %s31_s19 = sadd.s32 1, %s3428_s30 }
   0x4   : > { %p29_p0 = scmp.eq.s32.totalorder %s28_s18, 0  ;;  %p38_p1 = scmp.ne.s32.totalorder %s3428_s30, %s3424_s29 }
   0x5   : > { %p39_p2 = scmp.eq.s32.totalorder %s3432_s15, 0  ;;  %p2781_p4 = scmp.ge.s32.totalorder %s3432_s15, 2 }
   0x6   : > { %s3543_s20 = scalar_select %p29_p0, %s3428_s30, %s31_s19  }
   0x7   : > { %p40_p3 = por %p39_p2, %p38_p1  ;;  %404 = sbr.rel (%p2781_p4) target bundleno = 22 (0x16), region = 64 }
   0xe   : > { %407 = sbr.rel (!%p40_p3) target bundleno = 22 (0x16), region = 68  ;;  %s409_s21 = sand.u32 (%p40_p3), 1, %s3428_s30  }
   0xf   : > { %s2783_s22 = sshll.u32 (%p40_p3), %s3432_s15, 3  ;;  %s2782_s23 = sshll.u32 (%p40_p3), %s409_s21, 6 }
  0x10   : > { %s413_s26 = scalar_lea.vmem (%p40_p3), %s4007_s0, %s2783_s22  ;;  %s411_s27 = scalar_lea.vmem (%p40_p3), [#allocation3], %s2782_s23 }
  0x11   : > { %v455_v0 = vld [vmem:[%s413_s26] sm:$0xff] (%p40_p3)  ;;  %v457_v1 = vld [vmem:[%s413_s26 + $0x10] sm:$0xff] (%p40_p3) }
  0x12   : > { %v459_v2 = vld [vmem:[%s413_s26 + $0x20] sm:$0xff] (%p40_p3)  ;;  %456 = vst [vmem:[%s411_s27] sm:$0xff] (%p40_p3), %v455_v0  ;;  %458 = vst [vmem:[%s411_s27 + $0x8] sm:$0xff] (%p40_p3), %v457_v1  ;;  %v461_v3 = vld [vmem:[%s413_s26 + $0x30] sm:$0xff] (%p40_p3) }
  0x13   : > { %460 = vst [vmem:[%s411_s27 + $0x10] sm:$0xff] (%p40_p3), %v459_v2  ;;  %v463_v4 = vld [vmem:[%s413_s26 + $0x40] sm:$0xff] (%p40_p3)  ;;  %v465_v5 = vld [vmem:[%s413_s26 + $0x50] sm:$0xff] (%p40_p3)  ;;  %462 = vst [vmem:[%s411_s27 + $0x18] sm:$0xff] (%p40_p3), %v461_v3 }
  0x14   : > { %464 = vst [vmem:[%s411_s27 + $0x20] sm:$0xff] (%p40_p3), %v463_v4  ;;  %466 = vst [vmem:[%s411_s27 + $0x28] sm:$0xff] (%p40_p3), %v465_v5  ;;  %v467_v6 = vld [vmem:[%s413_s26 + $0x60] sm:$0xff] (%p40_p3)  ;;  %v469_v7 = vld [vmem:[%s413_s26 + $0x70] sm:$0xff] (%p40_p3) }
  0x15   : > { %468 = vst [vmem:[%s411_s27 + $0x30] sm:$0xff] %v467_v6  ;;  %470 = vst [vmem:[%s411_s27 + $0x38] sm:$0xff] %v469_v7 }
  0x16 PF: > { %p2784_p5 = scmp.ge.s32.totalorder %s3432_s15, 1  ;;  %p482_p6 = scmp.lt.s32.totalorder %s3432_s15, 3 }
  0x18   : > { %p483_p7 = pnand %p2784_p5, %p482_p6 }
  0x19   : > { %v552_v8 = vld [vmem:[%s4009_s2] sm:$0xff] (!%p483_p7)  ;;  %v553_v9 = vld [vmem:[%s4009_s2 + $0x8] sm:$0xff] (!%p483_p7)  ;;  %vm596_vm0 = vcmask (!%p483_p7), 1045504   ;;  %v3434_v11 = vmov (!%p483_p7), 0.0|0.0   ;;  %s489_s24 = sand.u32 (!%p483_p7), 1, %s3424_s29   ;;  %v554_v13 = vld [vmem:[%s4009_s2 + $0x10] sm:$0xff] (!%p483_p7) }
  0x1a   : > { %486 = sbr.rel (%p483_p7) target bundleno = 11459 (0x2cc3), region = 110  ;;  %v551_v10 = vld [vmem:[%s4008_s1] sm:$0x3f] (!%p483_p7)  ;;  %3188 = vmatprep.subr.bf16.mxu1 (!%p483_p7), %v3434_v11  ;;  %v3563_v12 = vpack.c.bf16 (!%p483_p7), %v553_v9, %v552_v8  ;;  %v555_v14 = vld [vmem:[%s4009_s2 + $0x18] sm:$0xff] (!%p483_p7)  ;;  %s2785_s18 = sshll.u32 (!%p483_p7), %s489_s24, 6  ;;  %vm571_vm1 = vcmask (!%p483_p7), 48128  }
  0x1b   : > { %2945 = vmatprep.subr.msk.mxu0 (!%p483_p7), %vm596_vm0, %v551_v10  ;;  %vm3435_vm2 = vmmov (!%p483_p7), 0   ;;  %v3436_v15 = vmov (!%p483_p7), 0.0   ;;  %v3575_v16 = vpack.c.bf16 (!%p483_p7), %v555_v14, %v554_v13  ;;  %s3578_s29 = scalar_lea.vmem (!%p483_p7), [#allocation3], %s2785_s18  ;;  %vm545_vm3 = vcmask (!%p483_p7), 523264   ;;  %v3601_v19 = vld [vmem:[%s4010_s3] ss:$0 sm:$0xff] (!%p483_p7) }
  0x1c   : > { %2946 = vmatpush3.msk.msra.mxu0 (!%p483_p7), %vm596_vm0, %v551_v10  ;;  %2967 = vmatprep.mubr.msk.f32.mxu1 (!%p483_p7), %vm3435_vm2, %v3436_v15  ;;  %v557_v17 = vld [vmem:[%s3578_s29] sm:$0xff] (!%p483_p7)  ;;  %v558_v18 = vld [vmem:[%s3578_s29 + $0x8] sm:$0xff] (!%p483_p7)  ;;  %v3437_v22 = vmov (!%p483_p7), 1.0   ;;  %vm547_vm4 = vcmask (!%p483_p7), 785408   ;;  %v549_v30 = vsel (!%p483_p7), %vm545_vm3, 0.5, %v3436_v15  ;;  %s3438_s22 = smov (!%p483_p7), 64  }
  0x1d   : > { %3190 = vmatpush3.bf16.msra.mxu1 (!%p483_p7), %v3563_v12  ;;  %3200 = vmatprep.subr.bf16.mxu0 (!%p483_p7), %v3434_v11  ;;  %v546_v23 = vsel (!%p483_p7), %vm545_vm3, 0.5, %v3437_v22  ;;  %v3608_v32 = vsel (!%p483_p7), %vm547_vm4, %v549_v30, 0.5  ;;  %s3439_s23 = smov (!%p483_p7), 32   ;;  %vm705_vm5 = vcmask (!%p483_p7), 261120   ;;  %v559_v57 = vld [vmem:[%s3578_s29 + $0x10] sm:$0xff] (!%p483_p7)  ;;  %v560_v58 = vld [vmem:[%s3578_s29 + $0x18] sm:$0xff] (!%p483_p7) }
  0x1e   : > { %3191 = vmatprep.subr.bf16.mxu1 (!%p483_p7), %v3434_v11  ;;  %2947 = vmatprep.mubr.msk.f32.mxu0 (!%p483_p7), %vm571_vm1, %v557_v17  ;;  %v3604_v25 = vsel (!%p483_p7), %vm547_vm4, %v546_v23, 0.5  ;;  %v561_v59 = vld [vmem:[%s3578_s29 + $0x20] sm:$0xff] (!%p483_p7)  ;;  %v562_v60 = vld [vmem:[%s3578_s29 + $0x28] sm:$0xff] (!%p483_p7)  ;;  %v563_v61 = vld [vmem:[%s3578_s29 + $0x30] sm:$0xff] (!%p483_p7)  ;;  %s3440_s24 = smov (!%p483_p7), 16   ;;  %s3441_s19 = smov (!%p483_p7), 96  }
  0x1f   : > { %2948 = vmatmul.mubr.msk.f32.vlgmr.msra.gmra.mrb[0].mxu0 (!%p483_p7), %vm571_vm1, %v558_v18  ;;  %v564_v62 = vld [vmem:[%s3578_s29 + $0x38] sm:$0xff] (!%p483_p7)  ;;  %p537_p8 = scmp.lt.s32.totalorder (!%p483_p7), %s2778_s16, 1  ;;  %vm2700_vm6 = vcmask (!%p483_p7), 130048   ;;  %vm2702_vm7 = vcmask (!%p483_p7), 392192   ;;  %vm2704_vm8 = vcmask (!%p483_p7), 654336  }
  0x20   : > { %3202 = vmatpush3.bf16.msra.mxu0 (!%p483_p7), %v3563_v12  ;;  %2950 = vmatprep.mubr.msk.f32.mxu0 (!%p483_p7), %vm571_vm1, %v559_v57 }
  0x21   : > { %3193 = vmatpush3.bf16.msra.mxu1 %v3575_v16  ;;  %3203 = vmatprep.subr.bf16.mxu0 %v3434_v11  ;;  %s4026_s16 = smov (!%p537_p8, %s2778_s16), 1 }
  0x22   : > { %3194 = vmatprep.subr.bf16.mxu1 %v3434_v11  ;;  %s2786_s21 = sshll.u32 %s4026_s16, 3 }
  0x23   : > { %2951 = vmatmul.mubr.msk.f32.gmra.mrb[2].mxu0 %vm571_vm1, %v560_v58  ;;  %s540_s26 = scalar_lea.vmem %s4020_s13, %s2786_s21 }
  0x24   : > { %2968 = vmatmul.mubr.f32.vlgmr.msra.gmra.mrb[0].mxu1 %v3436_v15  ;;  %3205 = vmatpush3.bf16.msra.mxu0 %v3575_v16 }
  0x25   : > { %3196 = vmatpush3.bf16.msra.mxu1 %v3563_v12  ;;  %2978 = vmatprep.mubr.msk.f32.mxu1 %vm3435_vm2, %v3436_v15 }
  0x26   : > { %3197 = vmatprep.subr.bf16.mxu1 %v3434_v11  ;;  %3212 = vmatprep.subr.bf16.mxu0 %v3434_v11 }
  0x27   : > { %2953 = vmatprep.mubr.msk.f32.mxu0 %vm571_vm1, %v561_v59 }
  0x28   : > { %2954 = vmatmul.mubr.msk.f32.gmra.mrb[4].mxu0 %vm571_vm1, %v562_v60 }
  0x29   : > { %3199 = vmatpush3.bf16.msra.mxu1 %v3575_v16  ;;  %2956 = vmatprep.mubr.msk.f32.mxu0 %vm571_vm1, %v563_v61 }
  0x2a   : > { %3206 = vmatprep.subr.bf16.mxu1 %v3434_v11 }
  0x2c   : > { %2957 = vmatmul.mubr.msk.f32.gmra.mrb[6].mxu0 %vm571_vm1, %v564_v62 }
  0x2d   : > { %2989 = vmatprep.mubr.msk.f32.mxu0 %vm3435_vm2, %v3436_v15 }
  0xf2   : > { %v2949_v20 = vpop.f32.mrb[0].mxu0 }
  0xf3   : > { %v666_v21 = vpop.f32.mrb[1].mxu0  ;;  %v672_v44 = vadd.f32 %v2949_v20, %v3601_v19 }
  0xf4   : > { %v667_v24 = vadd.f32 %v3601_v19, %v666_v21 }
  0xf6   : > { %v2952_v2 = vpop.f32.mrb[2].mxu0 }
  0xf7   : > { %v775_v26 = vpop.f32.mrb[0].mxu1  ;;  %v676_v3 = vpop.f32.mrb[3].mxu0 }
  0xf8   : > { %v779_v27 = vadd.f32 %v775_v26, %v667_v24  ;;  %v2969_v28 = vpop.f32.mrb[1].mxu1  ;;  %v677_v9 = vadd.f32 %v3601_v19, %v676_v3 }
  0xfa   : > { %v780_v29 = vmul.f32 %v779_v27, %v3604_v25 }
  0xfb   : > { %v3646_v4 = vpop.f32.mrb[4].mxu0 }
  0xfc   : > { %3342 = vtanh.f32 %v780_v29  ;;  %v3648_v5 = vpop.f32.mrb[5].mxu0  ;;  %v692_v3 = vadd.f32 %v3646_v4, %v3601_v19 }
  0xff   : > { %v3650_v6 = vpop.f32.mrb[6].mxu0 }
 0x100   : > { %v3652_v7 = vpop.f32.mrb[7].mxu0 }
 0x106   : > { %v3343_v31 = vpop.eup %3342 }
 0x107   : > { %v782_v33 = vmul.f32 %v3343_v31, %v3604_v25 }
 0x109   : > { %v783_v34 = vadd.f32 %v782_v33, %v3608_v32  ;;  %v682_v33 = vadd.f32 %v2952_v2, %v3601_v19 }
 0x10b   : > { %786 = vrot.lane.b32.xlu0 %v783_v34, %s3438_s22  ;;  %v784_v37 = vmul.f32 0.0, %v783_v34 }
 0x17d   : > { %v787_v35 = vpop.permute.xlu0 %786 }
 0x17e   : > { %v789_v36 = vmul.f32 %v787_v35, %v783_v34 }
 0x180   : > { %791 = vrot.lane.b32.xlu0 %v789_v36, %s3439_s23 }
 0x1f2   : > { %v792_v38 = vpop.permute.xlu0 %791 }
 0x1f3   : > { %v794_v39 = vadd.f32 %v792_v38, %v784_v37 }
 0x1f5   : > { %3344 = vtanh.f32 %v794_v39 }
 0x1ff   : > { %v3345_v40 = vpop.eup %3344 }
 0x200   : > { %797 = vrot.lane.b32.xlu1 %v3345_v40, %s3438_s22 }
 0x272   : > { %v798_v41 = vpop.permute.xlu1 %797 }
 0x273   : > { %v800_v42 = vmul.f32 %v798_v41, %v783_v34 }
 0x275   : > { %802 = vrot.lane.b32.xlu1 %v800_v42, %s3439_s23 }
 0x2e7   : > { %v803_v43 = vpop.permute.xlu1 %802 }
 0x2e8   : > { %805 = vst.msk [vmem:[#allocation2] sm:$0xff] %vm705_vm5, %v803_v43  ;;  %2979 = vmatmul.mubr.msk.f32.vlgmr.msra.gmra.mrb[2].mxu1 %vm705_vm5, %v803_v43 }
 0x2e9   : > { %3208 = vmatpush3.bf16.msra.mxu1 %v3563_v12  ;;  %3000 = vmatprep.mubr.msk.f32.mxu1 %vm3435_vm2, %v3436_v15 }
 0x2ea   : > { %3209 = vmatprep.subr.bf16.mxu1 %v3434_v11 }
 0x2ed   : > { %3211 = vmatpush3.bf16.msra.mxu1 %v3575_v16 }
 0x2ee   : > { %3218 = vmatprep.subr.bf16.mxu1 %v3434_v11 }
 0x3bb   : > { %v874_v45 = vpop.f32.mrb[2].mxu1 }
 0x3bc   : > { %v878_v46 = vadd.f32 %v874_v45, %v672_v44  ;;  %v2980_v47 = vpop.f32.mrb[3].mxu1 }
 0x3be   : > { %v879_v48 = vmul.f32 %v878_v46, %v3604_v25 }
 0x3c0   : > { %3346 = vtanh.f32 %v879_v48 }
 0x3ca   : > { %v3347_v49 = vpop.eup %3346 }
 0x3cb   : > { %v881_v50 = vmul.f32 %v3347_v49, %v3604_v25 }
 0x3cd   : > { %v882_v51 = vadd.f32 %v881_v50, %v3608_v32  ;;  %v687_v50 = vadd.f32 %v3601_v19, %v3648_v5 }
 0x3cf   : > { %885 = vrot.lane.b32.xlu0 %v882_v51, %s3438_s22  ;;  %v883_v54 = vmul.f32 %v882_v51, %v794_v39 }
 0x441   : > { %v886_v52 = vpop.permute.xlu0 %885 }
 0x442   : > { %v888_v53 = vmul.f32 %v886_v52, %v882_v51 }
 0x444   : > { %890 = vrot.lane.b32.xlu1 %v888_v53, %s3439_s23 }
 0x4b6   : > { %v891_v55 = vpop.permute.xlu1 %890 }
 0x4b7   : > { %v893_v56 = vadd.f32 %v891_v55, %v883_v54 }
 0x4b9   : > { %3348 = vtanh.f32 %v893_v56 }
 0x4c3   : > { %v3349_v63 = vpop.eup %3348 }
 0x4c4   : > { %896 = vrot.lane.b32.xlu0 %v3349_v63, %s3438_s22 }
 0x536   : > { %v897_v0 = vpop.permute.xlu0 %896 }
 0x537   : > { %v899_v1 = vmul.f32 %v897_v0, %v882_v51 }
 0x539   : > { %901 = vrot.lane.b32.xlu1 %v899_v1, %s3439_s23 }
 0x5ab   : > { %v902_v8 = vpop.permute.xlu1 %901 }
 0x5ac   : > { %905 = vst.msk [vmem:[#allocation2 + $0x8] sm:$0xff] %vm705_vm5, %v902_v8  ;;  %2990 = vmatmul.mubr.msk.f32.vlgmr.msra.gmra.mrb[8].mxu0 %vm705_vm5, %v902_v8 }
 0x5ad   : > { %3214 = vmatpush3.bf16.msra.mxu0 %v3563_v12  ;;  %3011 = vmatprep.mubr.msk.f32.mxu0 %vm3435_vm2, %v3436_v15 }
 0x5ae   : > { %3215 = vmatprep.subr.bf16.mxu0 %v3434_v11 }
 0x5b1   : > { %3217 = vmatpush3.bf16.msra.mxu0 %v3575_v16 }
 0x5b2   : > { %3224 = vmatprep.subr.bf16.mxu0 %v3434_v11 }
 0x67f   : > { %v974_v10 = vpop.f32.mrb[8].mxu0 }
 0x680   : > { %v978_v13 = vadd.f32 %v974_v10, %v677_v9  ;;  %v2991_v14 = vpop.f32.mrb[9].mxu0 }
 0x682   : > { %v979_v17 = vmul.f32 %v978_v13, %v3604_v25 }
 0x684   : > { %3350 = vtanh.f32 %v979_v17 }
 0x68e   : > { %v3351_v18 = vpop.eup %3350 }
 0x68f   : > { %v981_v20 = vmul.f32 %v3351_v18, %v3604_v25 }
 0x691   : > { %v982_v21 = vadd.f32 %v981_v20, %v3608_v32 }
 0x693   : > { %985 = vrot.lane.b32.xlu0 %v982_v21, %s3438_s22  ;;  %v983_v24 = vmul.f32 %v982_v21, %v893_v56 }
 0x705   : > { %v986_v22 = vpop.permute.xlu0 %985 }
 0x706   : > { %v988_v23 = vmul.f32 %v986_v22, %v982_v21  ;;  %v1507_v22 = vld [vmem:[%s4011_s4 + $0x8] sm:$0xff] }
 0x708   : > { %990 = vrot.lane.b32.xlu1 %v988_v23, %s3439_s23 }
 0x77a   : > { %v991_v26 = vpop.permute.xlu1 %990 }
 0x77b   : > { %v993_v27 = vadd.f32 %v991_v26, %v983_v24 }
 0x77d   : > { %3352 = vtanh.f32 %v993_v27 }
 0x787   : > { %v3353_v28 = vpop.eup %3352 }
 0x788   : > { %996 = vrot.lane.b32.xlu0 %v3353_v28, %s3438_s22  ;;  %v1508_v28 = vld [vmem:[%s4011_s4 + $0x10] sm:$0xff] }
 0x7fa   : > { %v997_v29 = vpop.permute.xlu0 %996 }
 0x7fb   : > { %v999_v30 = vmul.f32 %v997_v29, %v982_v21  ;;  %v1506_v21 = vld [vmem:[%s4011_s4] sm:$0xff]  ;;  %v1509_v29 = vld [vmem:[%s4011_s4 + $0x18] sm:$0xff] }
 0x7fc   : > { %v3236_v23 = vpack.c.bf16 %v1507_v22, %v1506_v21 }
 0x7fd   : > { %1001 = vrot.lane.b32.xlu1 %v999_v30, %s3439_s23  ;;  %v3240_v30 = vpack.c.bf16 %v1509_v29, %v1508_v28 }
 0x86f   : > { %v1002_v31 = vpop.permute.xlu1 %1001 }
 0x870   : > { %1005 = vst.msk [vmem:[#allocation2 + $0x10] sm:$0xff] %vm705_vm5, %v1002_v31  ;;  %3001 = vmatmul.mubr.msk.f32.vlgmr.msra.gmra.mrb[4].mxu1 %vm705_vm5, %v1002_v31 }
 0x871   : > { %3220 = vmatpush3.bf16.msra.mxu1 %v3563_v12  ;;  %3022 = vmatprep.mubr.msk.f32.mxu1 %vm3435_vm2, %v3436_v15 }
 0x872   : > { %3221 = vmatprep.subr.bf16.mxu1 %v3434_v11 }
 0x875   : > { %3223 = vmatpush3.bf16.msra.mxu1 %v3575_v16 }
 0x876   : > { %3230 = vmatprep.subr.bf16.mxu1 %v3434_v11 }
 0x943   : > { %v1074_v34 = vpop.f32.mrb[4].mxu1 }
 0x944   : > { %v1078_v35 = vadd.f32 %v1074_v34, %v682_v33  ;;  %v3002_v36 = vpop.f32.mrb[5].mxu1  ;;  %v1515_v33 = vld [vmem:[#allocation2] sm:$0xff]  ;;  %v1516_v34 = vld [vmem:[#allocation2 + $0x8] sm:$0xff] }
 0x946   : > { %v1079_v37 = vmul.f32 %v1078_v35, %v3604_v25  ;;  %v1517_v35 = vld [vmem:[#allocation2 + $0x10] sm:$0xff] }
 0x948   : > { %3354 = vtanh.f32 %v1079_v37 }
 0x952   : > { %v3355_v38 = vpop.eup %3354 }
 0x953   : > { %v1081_v39 = vmul.f32 %v3355_v38, %v3604_v25 }
 0x955   : > { %v1082_v40 = vadd.f32 %v1081_v39, %v3608_v32  ;;  %v697_v39 = vadd.f32 %v3601_v19, %v3652_v7 }
 0x957   : > { %1085 = vrot.lane.b32.xlu0 %v1082_v40, %s3438_s22  ;;  %v1083_v43 = vmul.f32 %v1082_v40, %v993_v27 }
 0x9c9   : > { %v1086_v41 = vpop.permute.xlu0 %1085 }
 0x9ca   : > { %v1088_v42 = vmul.f32 %v1086_v41, %v1082_v40 }
 0x9cc   : > { %1090 = vrot.lane.b32.xlu1 %v1088_v42, %s3439_s23 }
 0xa3e   : > { %v1091_v44 = vpop.permute.xlu1 %1090 }
 0xa3f   : > { %v1093_v45 = vadd.f32 %v1091_v44, %v1083_v43 }
 0xa41   : > { %3356 = vtanh.f32 %v1093_v45 }
 0xa4b   : > { %v3357_v46 = vpop.eup %3356 }
 0xa4c   : > { %1096 = vrot.lane.b32.xlu0 %v3357_v46, %s3438_s22 }
 0xabe   : > { %v1097_v47 = vpop.permute.xlu0 %1096 }
 0xabf   : > { %v1099_v48 = vmul.f32 %v1097_v47, %v1082_v40 }
 0xac1   : > { %1101 = vrot.lane.b32.xlu1 %v1099_v48, %s3439_s23 }
 0xb33   : > { %v1102_v49 = vpop.permute.xlu1 %1101 }
 0xb34   : > { %1105 = vst.msk [vmem:[#allocation2 + $0x18] sm:$0xff] %vm705_vm5, %v1102_v49  ;;  %3012 = vmatmul.mubr.msk.f32.vlgmr.msra.gmra.mrb[10].mxu0 %vm705_vm5, %v1102_v49 }
 0xb35   : > { %3226 = vmatpush3.bf16.msra.mxu0 %v3563_v12  ;;  %3033 = vmatprep.mubr.msk.f32.mxu0 %vm3435_vm2, %v3436_v15 }
 0xb36   : > { %3227 = vmatprep.subr.bf16.mxu0 %v3434_v11 }
 0xb39   : > { %3229 = vmatpush3.bf16.msra.mxu0 %v3575_v16 }
 0xb3a   : > { %3237 = vmatprep.subr.bf16.mxu0 %v3236_v23 }
 0xb3b   : > { %v1518_v36 = vld [vmem:[#allocation2 + $0x18] sm:$0xff] }
 0xc07   : > { %v1174_v51 = vpop.f32.mrb[10].mxu0 }
 0xc08   : > { %v1178_v52 = vadd.f32 %v1174_v51, %v687_v50  ;;  %v3013_v53 = vpop.f32.mrb[11].mxu0 }
 0xc0a   : > { %v1179_v54 = vmul.f32 %v1178_v52, %v3604_v25 }
 0xc0c   : > { %3358 = vtanh.f32 %v1179_v54 }
 0xc16   : > { %v3359_v55 = vpop.eup %3358 }
 0xc17   : > { %v1181_v56 = vmul.f32 %v3359_v55, %v3604_v25 }
 0xc19   : > { %v1182_v57 = vadd.f32 %v1181_v56, %v3608_v32 }
 0xc1b   : > { %1185 = vrot.lane.b32.xlu0 %v1182_v57, %s3438_s22  ;;  %v1183_v60 = vmul.f32 %v1182_v57, %v1093_v45 }
 0xc8d   : > { %v1186_v58 = vpop.permute.xlu0 %1185 }
 0xc8e   : > { %v1188_v59 = vmul.f32 %v1186_v58, %v1182_v57  ;;  %v1510_v58 = vld [vmem:[%s4012_s5] sm:$0xff] }
 0xc90   : > { %1190 = vrot.lane.b32.xlu1 %v1188_v59, %s3439_s23  ;;  %v1511_v59 = vld [vmem:[%s4012_s5 + $0x8] sm:$0xff] }
 0xd02   : > { %v1191_v61 = vpop.permute.xlu1 %1190 }
 0xd03   : > { %v1193_v62 = vadd.f32 %v1191_v61, %v1183_v60  ;;  %v3767_v60 = vpack.c.bf16 %v1511_v59, %v1510_v58  ;;  %v1512_v61 = vld [vmem:[%s4012_s5 + $0x10] sm:$0xff] }
 0xd05   : > { %3360 = vtanh.f32 %v1193_v62 }
 0xd0f   : > { %v3361_v63 = vpop.eup %3360 }
 0xd10   : > { %1196 = vrot.lane.b32.xlu0 %v3361_v63, %s3438_s22 }
 0xd82   : > { %v1197_v0 = vpop.permute.xlu0 %1196 }
 0xd83   : > { %v1199_v1 = vmul.f32 %v1197_v0, %v1182_v57 }
 0xd85   : > { %1201 = vrot.lane.b32.xlu1 %v1199_v1, %s3439_s23 }
 0xdf7   : > { %v1202_v2 = vpop.permute.xlu1 %1201 }
 0xdf8   : > { %1205 = vst.msk [vmem:[#allocation2 + $0x20] sm:$0xff] %vm705_vm5, %v1202_v2  ;;  %3023 = vmatmul.mubr.msk.f32.vlgmr.msra.gmra.mrb[6].mxu1 %vm705_vm5, %v1202_v2 }
 0xdf9   : > { %3232 = vmatpush3.bf16.msra.mxu1 %v3563_v12  ;;  %3044 = vmatprep.mubr.msk.f32.mxu1 %vm3435_vm2, %v3436_v15 }
 0xdfa   : > { %3233 = vmatprep.subr.bf16.mxu1 %v3434_v11 }
 0xdfd   : > { %3235 = vmatpush3.bf16.msra.mxu1 %v3575_v16 }
 0xdfe   : > { %3244 = vmatprep.subr.bf16.mxu1 %v3434_v11 }
 0xdff   : > { %v1519_v37 = vld [vmem:[#allocation2 + $0x20] sm:$0xff] }
 0xecb   : > { %v1274_v5 = vpop.f32.mrb[6].mxu1 }
 0xecc   : > { %v1278_v8 = vadd.f32 %v1274_v5, %v692_v3  ;;  %v3024_v9 = vpop.f32.mrb[7].mxu1  ;;  %v702_v5 = vadd.f32 %v3650_v6, %v3601_v19 }
 0xece   : > { %v1279_v10 = vmul.f32 %v1278_v8, %v3604_v25 }
 0xed0   : > { %3362 = vtanh.f32 %v1279_v10 }
 0xeda   : > { %v3363_v13 = vpop.eup %3362 }
 0xedb   : > { %v1281_v12 = vmul.f32 %v3363_v13, %v3604_v25  ;;  %v3803_v13 = vld [vmem:[%s4013_s6] ss:$0 sm:$0xff] }
 0xedd   : > { %v1282_v14 = vadd.f32 %v1281_v12, %v3608_v32 }
 0xedf   : > { %1285 = vrot.lane.b32.xlu0 %v1282_v14, %s3438_s22  ;;  %v1283_v18 = vmul.f32 %v1282_v14, %v1193_v62  ;;  %v1513_v62 = vld [vmem:[%s4012_s5 + $0x18] sm:$0xff] }
 0xee0   : > { %v3777_v63 = vpack.c.bf16 %v1513_v62, %v1512_v61 }
 0xf51   : > { %v1286_v17 = vpop.permute.xlu0 %1285 }
 0xf52   : > { %v1288_v16 = vmul.f32 %v1286_v17, %v1282_v14 }
 0xf54   : > { %1290 = vrot.lane.b32.xlu1 %v1288_v16, %s3439_s23 }
 0xfc6   : > { %v1291_v20 = vpop.permute.xlu1 %1290 }
 0xfc7   : > { %v1293_v4 = vadd.f32 %v1291_v20, %v1283_v18 }
 0xfc9   : > { %3364 = vtanh.f32 %v1293_v4 }
 0xfd3   : > { %v3365_v24 = vpop.eup %3364 }
 0xfd4   : > { %1296 = vrot.lane.b32.xlu0 %v3365_v24, %s3438_s22 }
0x1046   : > { %v1297_v26 = vpop.permute.xlu0 %1296 }
0x1047   : > { %v1299_v27 = vmul.f32 %v1297_v26, %v1282_v14 }
0x1049   : > { %1301 = vrot.lane.b32.xlu1 %v1299_v27, %s3439_s23 }
0x10bb   : > { %v1302_v31 = vpop.permute.xlu1 %1301 }
0x10bc   : > { %1305 = vst.msk [vmem:[#allocation2 + $0x28] sm:$0xff] %vm705_vm5, %v1302_v31  ;;  %3034 = vmatmul.mubr.msk.f32.vlgmr.msra.gmra.mrb[12].mxu0 %vm705_vm5, %v1302_v31 }
0x10bd   : > { %3239 = vmatpush3.bf16.msra.mxu0 %v3236_v23  ;;  %3055 = vmatprep.mubr.msk.f32.mxu0 %vm705_vm5, %v1515_v33 }
0x10be   : > { %3241 = vmatprep.subr.bf16.mxu0 %v3240_v30 }
0x10c1   : > { %3243 = vmatpush3.bf16.msra.mxu0 %v3240_v30 }
0x10c2   : > { %3256 = vmatprep.subr.bf16.mxu0 %v3434_v11 }
0x10c3   : > { %v1520_v38 = vld [vmem:[#allocation2 + $0x28] sm:$0xff] }
0x10c4   : > { %3056 = vmatmul.mubr.msk.f32.vlgmr.msra.gmra.mrb[14].mxu0 %vm705_vm5, %v1516_v34 }
0x10c5   : > { %3058 = vmatprep.mubr.msk.f32.mxu0 %vm705_vm5, %v1517_v35  ;;  %3258 = vmatpush3.bf16.msra.mxu0 %v3767_v60 }
0x10c6   : > { %3259 = vmatprep.subr.bf16.mxu0 %v3434_v11 }
0x10c8   : > { %3059 = vmatmul.mubr.msk.f32.gmra.mrb[16].mxu0 %vm705_vm5, %v1518_v36 }
0x10c9   : > { %3061 = vmatprep.mubr.msk.f32.mxu0 %vm705_vm5, %v1519_v37  ;;  %3261 = vmatpush3.bf16.msra.mxu0 %v3777_v63 }
0x10ca   : > { %3268 = vmatprep.subr.bf16.mxu0 %v3434_v11 }
0x10cc   : > { %3062 = vmatmul.mubr.msk.f32.gmra.mrb[18].mxu0 %vm705_vm5, %v1520_v38 }
0x118f   : > { %v1374_v40 = vpop.f32.mrb[12].mxu0 }
0x1190   : > { %v1378_v41 = vadd.f32 %v1374_v40, %v697_v39  ;;  %v3035_v42 = vpop.f32.mrb[13].mxu0 }
0x1192   : > { %v1379_v43 = vmul.f32 %v1378_v41, %v3604_v25 }
0x1194   : > { %3366 = vtanh.f32 %v1379_v43 }
0x1197   : > { %v3743_v44 = vpop.f32.mrb[14].mxu0 }
0x1198   : > { %v1619_v45 = vpop.f32.mrb[15].mxu0  ;;  %v1625_v43 = vadd.f32 %v3743_v44, %v3803_v13 }
0x1199   : > { %v1620_v12 = vadd.f32 %v3803_v13, %v1619_v45 }
0x119b   : > { %v3745_v46 = vpop.f32.mrb[16].mxu0 }
0x119c   : > { %v3747_v47 = vpop.f32.mrb[17].mxu0 }
0x119e   : > { %v3367_v48 = vpop.eup %3366 }
0x119f   : > { %v3749_v49 = vpop.f32.mrb[18].mxu0  ;;  %v1381_v50 = vmul.f32 %v3367_v48, %v3604_v25 }
0x11a0   : > { %v3752_v51 = vpop.f32.mrb[19].mxu0 }
0x11a1   : > { %v1382_v7 = vadd.f32 %v1381_v50, %v3608_v32 }
0x11a3   : > { %1385 = vrot.lane.b32.xlu0 %v1382_v7, %s3438_s22  ;;  %v1383_v54 = vmul.f32 %v1382_v7, %v1293_v4 }
0x1215   : > { %v1386_v52 = vpop.permute.xlu0 %1385 }
0x1216   : > { %v1388_v53 = vmul.f32 %v1386_v52, %v1382_v7 }
0x1218   : > { %1390 = vrot.lane.b32.xlu1 %v1388_v53, %s3439_s23 }
0x128a   : > { %v1391_v55 = vpop.permute.xlu1 %1390 }
0x128b   : > { %v3757_v56 = vadd.f32 %v1391_v55, %v1383_v54 }
0x128d   : > { %3368 = vtanh.f32 %v3757_v56 }
0x1297   : > { %v3369_v57 = vpop.eup %3368 }
0x1298   : > { %1396 = vrot.lane.b32.xlu0 %v3369_v57, %s3438_s22 }
0x130a   : > { %v1397_v0 = vpop.permute.xlu0 %1396 }
0x130b   : > { %v1399_v1 = vmul.f32 %v1397_v0, %v1382_v7 }
0x130d   : > { %1401 = vrot.lane.b32.xlu1 %v1399_v1, %s3439_s23 }
0x137f   : > { %v1402_v2 = vpop.permute.xlu1 %1401 }
0x1380   : > { %1405 = vst.msk [vmem:[#allocation2 + $0x30] sm:$0xff] %vm705_vm5, %v1402_v2  ;;  %3045 = vmatmul.mubr.msk.f32.vlgmr.msra.gmra.mrb[8].mxu1 %vm705_vm5, %v1402_v2 }
0x1381   : > { %3246 = vmatpush3.bf16.msra.mxu1 %v3767_v60  ;;  %3075 = vmatprep.mubr.msk.f32.mxu1 %vm3435_vm2, %v3436_v15 }
0x1382   : > { %3247 = vmatprep.subr.bf16.mxu1 %v3434_v11 }
0x1385   : > { %3249 = vmatpush3.bf16.msra.mxu1 %v3777_v63 }
0x1386   : > { %3250 = vmatprep.subr.bf16.mxu1 %v3434_v11 }
0x1387   : > { %v1521_v3 = vld [vmem:[#allocation2 + $0x30] sm:$0xff] }
0x1388   : > { %3076 = vmatmul.mubr.f32.vlgmr.msra.gmra.mrb[10].mxu1 %v3436_v15  ;;  %3064 = vmatprep.mubr.msk.f32.mxu0 %vm705_vm5, %v1521_v3 }
0x1389   : > { %3252 = vmatpush3.bf16.msra.mxu1 %v3767_v60  ;;  %3086 = vmatprep.mubr.msk.f32.mxu1 %vm3435_vm2, %v3436_v15 }
0x138a   : > { %3253 = vmatprep.subr.bf16.mxu1 %v3434_v11 }
0x138d   : > { %3255 = vmatpush3.bf16.msra.mxu1 %v3777_v63 }
0x138e   : > { %3262 = vmatprep.subr.bf16.mxu1 %v3434_v11 }
0x1453   : > { %v1474_v8 = vpop.f32.mrb[8].mxu1 }
0x1454   : > { %v1478_v9 = vadd.f32 %v1474_v8, %v702_v5  ;;  %v3046_v10 = vpop.f32.mrb[9].mxu1  ;;  %v1630_v8 = vadd.f32 %v3803_v13, %v3747_v47 }
0x1456   : > { %v1479_v22 = vmul.f32 %v1478_v9, %v3604_v25 }
0x145b   : > { %v1724_v14 = vpop.f32.mrb[10].mxu1 }
0x145c   : > { %v1728_v17 = vadd.f32 %v1724_v14, %v1620_v12  ;;  %v3077_v16 = vpop.f32.mrb[11].mxu1 }
0x145e   : > { %v1729_v18 = vmul.f32 %v1728_v17, %v3604_v25 }
0x1460   : > { %3370 = vtanh.f32 %v1729_v18 }
0x1461   : > { %3372 = vtanh.f32 %v1479_v22 }
0x146a   : > { %v3371_v20 = vpop.eup %3370 }
0x146b   : > { %v1731_v4 = vmul.f32 %v3371_v20, %v3604_v25  ;;  %v3373_v27 = vpop.eup %3372 }
0x146c   : > { %v1481_v28 = vmul.f32 %v3373_v27, %v3604_v25 }
0x146d   : > { %v1732_v19 = vadd.f32 %v1731_v4, %v3608_v32 }
0x146e   : > { %v1482_v30 = vadd.f32 %v1481_v28, %v3608_v32 }
0x146f   : > { %1735 = vrot.lane.b32.xlu0 %v1732_v19, %s3438_s22  ;;  %v1733_v23 = vmul.f32 0.0, %v1732_v19 }
0x1470   : > { %v1483_v37 = vmul.f32 %v1482_v30, %v3757_v56 }
0x14e1   : > { %v1736_v6 = vpop.permute.xlu0 %1735 }
0x14e2   : > { %v1738_v21 = vmul.f32 %v1736_v6, %v1732_v19 }
0x14e4   : > { %1740 = vrot.lane.b32.xlu1 %v1738_v21, %s3439_s23 }
0x1556   : > { %v1741_v24 = vpop.permute.xlu1 %1740 }
0x1557   : > { %v1743_v26 = vadd.f32 %v1741_v24, %v1733_v23 }
0x1559   : > { %3374 = vtanh.f32 %v1743_v26 }
0x1563   : > { %v3375_v29 = vpop.eup %3374 }
0x1564   : > { %1746 = vrot.lane.b32.xlu0 %v3375_v29, %s3438_s22 }
0x1568   : > { %1485 = vrot.lane.b32.xlu0 %v1482_v30, %s3438_s22 }
0x15d6   : > { %v1747_v31 = vpop.permute.xlu0 %1746 }
0x15d7   : > { %v1749_v33 = vmul.f32 %v1747_v31, %v1732_v19 }
0x15d9   : > { %1751 = vrot.lane.b32.xlu1 %v1749_v33, %s3439_s23 }
0x15da   : > { %v1486_v34 = vpop.permute.xlu0 %1485 }
0x15db   : > { %v1488_v35 = vmul.f32 %v1486_v34, %v1482_v30 }
0x15dd   : > { %1490 = vrot.lane.b32.xlu0 %v1488_v35, %s3439_s23 }
0x164b   : > { %v1752_v36 = vpop.permute.xlu1 %1751 }
0x164c   : > { %3087 = vmatmul.mubr.msk.f32.vlgmr.msra.gmra.mrb[12].mxu1 %vm705_vm5, %v1752_v36 }
0x164d   : > { %3264 = vmatpush3.bf16.msra.mxu1 %v3767_v60  ;;  %3108 = vmatprep.mubr.msk.f32.mxu1 %vm3435_vm2, %v3436_v15 }
0x164e   : > { %3265 = vmatprep.subr.bf16.mxu1 %v3434_v11 }
0x164f   : > { %v1491_v38 = vpop.permute.xlu0 %1490 }
0x1650   : > { %v1493_v39 = vadd.f32 %v1491_v38, %v1483_v37 }
0x1651   : > { %3267 = vmatpush3.bf16.msra.mxu1 %v3777_v63 }
0x1652   : > { %3376 = vtanh.f32 %v1493_v39  ;;  %3274 = vmatprep.subr.bf16.mxu1 %v3434_v11 }
0x165c   : > { %v3377_v40 = vpop.eup %3376 }
0x165d   : > { %1496 = vrot.lane.b32.xlu0 %v3377_v40, %s3438_s22 }
0x16cf   : > { %v1497_v41 = vpop.permute.xlu0 %1496 }
0x16d0   : > { %v1499_v42 = vmul.f32 %v1497_v41, %v1482_v30 }
0x16d2   : > { %1501 = vrot.lane.b32.xlu0 %v1499_v42, %s3439_s23 }
0x171f   : > { %v1821_v45 = vpop.f32.mrb[12].mxu1 }
0x1720   : > { %v1825_v48 = vadd.f32 %v1821_v45, %v1625_v43  ;;  %v3088_v50 = vpop.f32.mrb[13].mxu1  ;;  %v1640_v43 = vadd.f32 %v3803_v13, %v3752_v51 }
0x1722   : > { %v1826_v7 = vmul.f32 %v1825_v48, %v3604_v25 }
0x1724   : > { %3378 = vtanh.f32 %v1826_v7 }
0x172e   : > { %v3379_v52 = vpop.eup %3378 }
0x172f   : > { %v1828_v53 = vmul.f32 %v3379_v52, %v3604_v25 }
0x1731   : > { %v1829_v54 = vadd.f32 %v1828_v53, %v3608_v32 }
0x1733   : > { %1832 = vrot.lane.b32.xlu1 %v1829_v54, %s3438_s22  ;;  %v1830_v58 = vmul.f32 %v1829_v54, %v1743_v26  ;;  %v1635_v26 = vadd.f32 %v3745_v46, %v3803_v13 }
0x1744   : > { %v1502_v55 = vpop.permute.xlu0 %1501 }
0x1745   : > { %1505 = vst.msk [vmem:[#allocation2 + $0x38] sm:$0xff] %vm705_vm5, %v1502_v55 }
0x174c   : > { %v1522_v56 = vld [vmem:[#allocation2 + $0x38] sm:$0xff] }
0x174d   : > { %3065 = vmatmul.mubr.msk.f32.gmra.mrb[20].mxu0 %vm705_vm5, %v1522_v56 }
0x174e   : > { %3097 = vmatprep.mubr.msk.f32.mxu0 %vm3435_vm2, %v3436_v15 }
0x17a5   : > { %v1833_v44 = vpop.permute.xlu1 %1832 }
0x17a6   : > { %v1835_v57 = vmul.f32 %v1833_v44, %v1829_v54 }
0x17a8   : > { %1837 = vrot.lane.b32.xlu1 %v1835_v57, %s3439_s23 }
0x181a   : > { %v1838_v59 = vpop.permute.xlu1 %1837 }
0x181b   : > { %v1840_v61 = vadd.f32 %v1838_v59, %v1830_v58 }
0x181d   : > { %3380 = vtanh.f32 %v1840_v61 }
0x1820   : > { %v3839_v62 = vpop.f32.mrb[20].mxu0 }
0x1821   : > { %v3841_v0 = vpop.f32.mrb[21].mxu0 }
0x1827   : > { %v3381_v1 = vpop.eup %3380 }
0x1828   : > { %1843 = vrot.lane.b32.xlu1 %v3381_v1, %s3438_s22 }
0x189a   : > { %v1844_v2 = vpop.permute.xlu1 %1843 }
0x189b   : > { %v1846_v3 = vmul.f32 %v1844_v2, %v1829_v54  ;;  %v1645_v2 = vadd.f32 %v3749_v49, %v3803_v13 }
0x189d   : > { %1848 = vrot.lane.b32.xlu1 %v1846_v3, %s3439_s23 }
0x190f   : > { %v1849_v5 = vpop.permute.xlu1 %1848 }
0x1910   : > { %3098 = vmatmul.mubr.msk.f32.vlgmr.msra.gmra.mrb[22].mxu0 %vm705_vm5, %v1849_v5 }
0x1911   : > { %3270 = vmatpush3.bf16.msra.mxu0 %v3767_v60  ;;  %3119 = vmatprep.mubr.msk.f32.mxu0 %vm3435_vm2, %v3436_v15 }
0x1912   : > { %3271 = vmatprep.subr.bf16.mxu0 %v3434_v11 }
0x1915   : > { %3273 = vmatpush3.bf16.msra.mxu0 %v3777_v63 }
0x1916   : > { %3280 = vmatprep.subr.bf16.mxu0 %v3434_v11 }
0x19e3   : > { %v1918_v9 = vpop.f32.mrb[22].mxu0 }
0x19e4   : > { %v1922_v10 = vadd.f32 %v1918_v9, %v1630_v8  ;;  %v3099_v12 = vpop.f32.mrb[23].mxu0 }
0x19e6   : > { %v1923_v14 = vmul.f32 %v1922_v10, %v3604_v25 }
0x19e8   : > { %3382 = vtanh.f32 %v1923_v14 }
0x19f2   : > { %v3383_v17 = vpop.eup %3382 }
0x19f3   : > { %v1925_v16 = vmul.f32 %v3383_v17, %v3604_v25 }
0x19f5   : > { %v1926_v18 = vadd.f32 %v1925_v16, %v3608_v32 }
0x19f7   : > { %1929 = vrot.lane.b32.xlu0 %v1926_v18, %s3438_s22  ;;  %v1927_v19 = vmul.f32 %v1926_v18, %v1840_v61 }
0x1a69   : > { %v1930_v20 = vpop.permute.xlu0 %1929 }
0x1a6a   : > { %v1932_v4 = vmul.f32 %v1930_v20, %v1926_v18 }
0x1a6c   : > { %1934 = vrot.lane.b32.xlu1 %v1932_v4, %s3439_s23 }
0x1ade   : > { %v1935_v6 = vpop.permute.xlu1 %1934 }
0x1adf   : > { %v1937_v47 = vadd.f32 %v1935_v6, %v1927_v19  ;;  %v1650_v6 = vadd.f32 %v3803_v13, %v3841_v0 }
0x1ae1   : > { %3384 = vtanh.f32 %v1937_v47 }
0x1aeb   : > { %v3385_v21 = vpop.eup %3384 }
0x1aec   : > { %1940 = vrot.lane.b32.xlu0 %v3385_v21, %s3438_s22 }
0x1b5e   : > { %v1941_v22 = vpop.permute.xlu0 %1940 }
0x1b5f   : > { %v1943_v23 = vmul.f32 %v1941_v22, %v1926_v18 }
0x1b61   : > { %1945 = vrot.lane.b32.xlu1 %v1943_v23, %s3439_s23 }
0x1bd3   : > { %v1946_v24 = vpop.permute.xlu1 %1945 }
0x1bd4   : > { %3109 = vmatmul.mubr.msk.f32.vlgmr.msra.gmra.mrb[14].mxu1 %vm705_vm5, %v1946_v24 }
0x1bd5   : > { %3276 = vmatpush3.bf16.msra.mxu1 %v3767_v60  ;;  %3130 = vmatprep.mubr.msk.f32.mxu1 %vm3435_vm2, %v3436_v15 }
0x1bd6   : > { %3277 = vmatprep.subr.bf16.mxu1 %v3434_v11 }
0x1bd9   : > { %3279 = vmatpush3.bf16.msra.mxu1 %v3777_v63 }
0x1bda   : > { %3286 = vmatprep.subr.bf16.mxu1 %v3434_v11 }
0x1ca7   : > { %v2015_v27 = vpop.f32.mrb[14].mxu1 }
0x1ca8   : > { %v2019_v28 = vadd.f32 %v2015_v27, %v1635_v26  ;;  %v3110_v29 = vpop.f32.mrb[15].mxu1 }
0x1caa   : > { %v2020_v30 = vmul.f32 %v2019_v28, %v3604_v25 }
0x1cac   : > { %3386 = vtanh.f32 %v2020_v30 }
0x1cb6   : > { %v3387_v31 = vpop.eup %3386 }
0x1cb7   : > { %v2022_v33 = vmul.f32 %v3387_v31, %v3604_v25 }
0x1cb9   : > { %v2023_v34 = vadd.f32 %v2022_v33, %v3608_v32 }
0x1cbb   : > { %2026 = vrot.lane.b32.xlu0 %v2023_v34, %s3438_s22  ;;  %v2024_v37 = vmul.f32 %v2023_v34, %v1937_v47 }
0x1d2d   : > { %v2027_v35 = vpop.permute.xlu0 %2026 }
0x1d2e   : > { %v2029_v36 = vmul.f32 %v2027_v35, %v2023_v34 }
0x1d30   : > { %2031 = vrot.lane.b32.xlu1 %v2029_v36, %s3439_s23 }
0x1da2   : > { %v2032_v38 = vpop.permute.xlu1 %2031 }
0x1da3   : > { %v2034_v46 = vadd.f32 %v2032_v38, %v2024_v37  ;;  %v1655_v37 = vadd.f32 %v3839_v62, %v3803_v13  ;;  %v2429_v62 = vld [vmem:[%s4014_s7] sm:$0xff] }
0x1da5   : > { %3388 = vtanh.f32 %v2034_v46 }
0x1daf   : > { %v3389_v39 = vpop.eup %3388 }
0x1db0   : > { %2037 = vrot.lane.b32.xlu0 %v3389_v39, %s3438_s22 }
0x1e22   : > { %v2038_v40 = vpop.permute.xlu0 %2037 }
0x1e23   : > { %v2040_v41 = vmul.f32 %v2038_v40, %v2023_v34 }
0x1e25   : > { %2042 = vrot.lane.b32.xlu1 %v2040_v41, %s3439_s23 }
0x1e97   : > { %v2043_v42 = vpop.permute.xlu1 %2042 }
0x1e98   : > { %3120 = vmatmul.mubr.msk.f32.vlgmr.msra.gmra.mrb[24].mxu0 %vm705_vm5, %v2043_v42 }
0x1e99   : > { %3282 = vmatpush3.bf16.msra.mxu0 %v3767_v60  ;;  %3141 = vmatprep.mubr.msk.f32.mxu0 %vm3435_vm2, %v3436_v15 }
0x1e9a   : > { %3283 = vmatprep.subr.bf16.mxu0 %v3434_v11 }
0x1e9d   : > { %3285 = vmatpush3.bf16.msra.mxu0 %v3777_v63 }
0x1e9e   : > { %3292 = vmatprep.subr.bf16.mxu0 %v3434_v11 }
0x1f6b   : > { %v2112_v45 = vpop.f32.mrb[24].mxu0 }
0x1f6c   : > { %v2116_v48 = vadd.f32 %v2112_v45, %v1640_v43  ;;  %v3121_v50 = vpop.f32.mrb[25].mxu0 }
0x1f6e   : > { %v2117_v7 = vmul.f32 %v2116_v48, %v3604_v25 }
0x1f70   : > { %3390 = vtanh.f32 %v2117_v7 }
0x1f7a   : > { %v3391_v52 = vpop.eup %3390 }
0x1f7b   : > { %v2119_v53 = vmul.f32 %v3391_v52, %v3604_v25 }
0x1f7d   : > { %v2120_v54 = vadd.f32 %v2119_v53, %v3608_v32  ;;  %v2432_v53 = vld [vmem:[%s4014_s7 + $0x18] sm:$0xff] }
0x1f7f   : > { %2123 = vrot.lane.b32.xlu0 %v2120_v54, %s3438_s22  ;;  %v2121_v44 = vmul.f32 %v2120_v54, %v2034_v46 }
0x1ff1   : > { %v2124_v55 = vpop.permute.xlu0 %2123 }
0x1ff2   : > { %v2126_v56 = vmul.f32 %v2124_v55, %v2120_v54 }
0x1ff4   : > { %2128 = vrot.lane.b32.xlu1 %v2126_v56, %s3439_s23 }
0x2066   : > { %v2129_v57 = vpop.permute.xlu1 %2128 }
0x2067   : > { %v2131_v51 = vadd.f32 %v2129_v57, %v2121_v44 }
0x2069   : > { %3392 = vtanh.f32 %v2131_v51 }
0x2073   : > { %v3393_v58 = vpop.eup %3392 }
0x2074   : > { %2134 = vrot.lane.b32.xlu0 %v3393_v58, %s3438_s22  ;;  %v2517_v58 = vld [vmem:[%s4016_s9 + $0x8] sm:$0xff] }
0x20e6   : > { %v2135_v59 = vpop.permute.xlu0 %2134 }
0x20e7   : > { %v2137_v61 = vmul.f32 %v2135_v59, %v2120_v54  ;;  %v2518_v59 = vld [vmem:[%s4016_s9 + $0x10] sm:$0xff] }
0x20e9   : > { %2139 = vrot.lane.b32.xlu1 %v2137_v61, %s3439_s23 }
0x215b   : > { %v2140_v1 = vpop.permute.xlu1 %2139 }
0x215c   : > { %3131 = vmatmul.mubr.msk.f32.vlgmr.msra.gmra.mrb[16].mxu1 %vm705_vm5, %v2140_v1  ;;  %v2519_v1 = vld [vmem:[%s4016_s9 + $0x18] sm:$0xff] }
0x215d   : > { %3288 = vmatpush3.bf16.msra.mxu1 %v3767_v60  ;;  %3152 = vmatprep.mubr.msk.f32.mxu1 %vm3435_vm2, %v3436_v15 }
0x215e   : > { %3289 = vmatprep.subr.bf16.mxu1 %v3434_v11 }
0x2161   : > { %3291 = vmatpush3.bf16.msra.mxu1 %v3777_v63 }
0x2162   : > { %3298 = vmatprep.subr.bf16.mxu1 %v3434_v11 }
0x222f   : > { %v2209_v3 = vpop.f32.mrb[16].mxu1 }
0x2230   : > { %v2213_v5 = vadd.f32 %v2209_v3, %v1645_v2  ;;  %v3132_v8 = vpop.f32.mrb[17].mxu1  ;;  %v3302_v2 = vpack.c.bf16 %v2519_v1, %v2518_v59 }
0x2232   : > { %v2214_v9 = vmul.f32 %v2213_v5, %v3604_v25 }
0x2234   : > { %3394 = vtanh.f32 %v2214_v9 }
0x223e   : > { %v3395_v10 = vpop.eup %3394 }
0x223f   : > { %v2216_v60 = vmul.f32 %v3395_v10, %v3604_v25  ;;  %v2823_v10 = vld [vmem:[%s4017_s10] ss:$0 sm:$0xff] }
0x2241   : > { %v2217_v12 = vadd.f32 %v2216_v60, %v3608_v32 }
0x2243   : > { %2220 = vrot.lane.b32.xlu0 %v2217_v12, %s3438_s22  ;;  %v2218_v17 = vmul.f32 %v2217_v12, %v2131_v51  ;;  %v2516_v51 = vld [vmem:[%s4016_s9] sm:$0xff] }
0x2244   : > { %v3299_v61 = vpack.c.bf16 %v2517_v58, %v2516_v51 }
0x22b5   : > { %v2221_v14 = vpop.permute.xlu0 %2220 }
0x22b6   : > { %v2223_v63 = vmul.f32 %v2221_v14, %v2217_v12 }
0x22b8   : > { %2225 = vrot.lane.b32.xlu1 %v2223_v63, %s3439_s23 }
0x232a   : > { %v2226_v16 = vpop.permute.xlu1 %2225 }
0x232b   : > { %v2228_v49 = vadd.f32 %v2226_v16, %v2218_v17  ;;  %v2612_v17 = vld [vmem:[%s4018_s11] sm:$0xff]  ;;  %v2613_v16 = vld [vmem:[%s4018_s11 + $0x8] sm:$0xff] }
0x232d   : > { %3396 = vtanh.f32 %v2228_v49 }
0x2337   : > { %v3397_v18 = vpop.eup %3396 }
0x2338   : > { %2231 = vrot.lane.b32.xlu0 %v3397_v18, %s3438_s22 }
0x23aa   : > { %v2232_v20 = vpop.permute.xlu0 %2231 }
0x23ab   : > { %v2234_v4 = vmul.f32 %v2232_v20, %v2217_v12  ;;  %v2614_v20 = vld [vmem:[%s4018_s11 + $0x10] sm:$0xff] }
0x23ad   : > { %2236 = vrot.lane.b32.xlu1 %v2234_v4, %s3439_s23  ;;  %v2615_v4 = vld [vmem:[%s4018_s11 + $0x18] sm:$0xff] }
0x241f   : > { %v2237_v19 = vpop.permute.xlu1 %2236 }
0x2420   : > { %3142 = vmatmul.mubr.msk.f32.vlgmr.msra.gmra.mrb[26].mxu0 %vm705_vm5, %v2237_v19  ;;  %v3308_v19 = vpack.c.bf16 %v2615_v4, %v2614_v20 }
0x2421   : > { %3163 = vmatprep.mubr.msk.f32.mxu0 %vm3435_vm2, %v3436_v15 }
0x24f3   : > { %v2306_v47 = vpop.f32.mrb[26].mxu0 }
0x24f4   : > { %v2310_v21 = vadd.f32 %v2306_v47, %v1650_v6  ;;  %v3143_v22 = vpop.f32.mrb[27].mxu0 }
0x24f6   : > { %v2311_v23 = vmul.f32 %v2310_v21, %v3604_v25 }
0x24f8   : > { %3398 = vtanh.f32 %v2311_v23 }
0x2502   : > { %v3399_v24 = vpop.eup %3398 }
0x2503   : > { %v2313_v26 = vmul.f32 %v3399_v24, %v3604_v25 }
0x2505   : > { %v2314_v27 = vadd.f32 %v2313_v26, %v3608_v32  ;;  %v2825_v26 = vld [vmem:[%s4019_s12] ss:$0 sm:$0xff] }
0x2507   : > { %2317 = vrot.lane.b32.xlu0 %v2314_v27, %s3438_s22  ;;  %v2315_v30 = vmul.f32 %v2314_v27, %v2228_v49  ;;  %v3305_v49 = vpack.c.bf16 %v2613_v16, %v2612_v17 }
0x2579   : > { %v2318_v28 = vpop.permute.xlu0 %2317 }
0x257a   : > { %v2320_v29 = vmul.f32 %v2318_v28, %v2314_v27 }
0x257c   : > { %2322 = vrot.lane.b32.xlu1 %v2320_v29, %s3439_s23 }
0x25ee   : > { %v2323_v31 = vpop.permute.xlu1 %2322 }
0x25ef   : > { %v2325_v0 = vadd.f32 %v2323_v31, %v2315_v30 }
0x25f1   : > { %3400 = vtanh.f32 %v2325_v0 }
0x25fb   : > { %v3401_v33 = vpop.eup %3400 }
0x25fc   : > { %2328 = vrot.lane.b32.xlu0 %v3401_v33, %s3438_s22 }
0x266e   : > { %v2329_v34 = vpop.permute.xlu0 %2328 }
0x266f   : > { %v2331_v35 = vmul.f32 %v2329_v34, %v2314_v27 }
0x2671   : > { %2333 = vrot.lane.b32.xlu1 %v2331_v35, %s3439_s23 }
0x26e3   : > { %v2334_v36 = vpop.permute.xlu1 %2333 }
0x26e4   : > { %3153 = vmatmul.mubr.msk.f32.vlgmr.msra.gmra.mrb[18].mxu1 %vm705_vm5, %v2334_v36 }
0x26e5   : > { %3174 = vmatprep.mubr.msk.f32.mxu1 %vm3435_vm2, %v3436_v15  ;;  %3300 = vmatpush3.bf16.msra.mxu1 %v3299_v61 }
0x26e6   : > { %3301 = vmatprep.subr.bf16.mxu1 %v3434_v11 }
0x26e9   : > { %3303 = vmatpush3.bf16.msra.mxu1 %v3302_v2 }
0x27b7   : > { %v2403_v38 = vpop.f32.mrb[18].mxu1 }
0x27b8   : > { %v2407_v46 = vadd.f32 %v2403_v38, %v1655_v37  ;;  %v3154_v39 = vpop.f32.mrb[19].mxu1 }
0x27ba   : > { %v2408_v40 = vmul.f32 %v2407_v46, %v3604_v25 }
0x27bc   : > { %3402 = vtanh.f32 %v2408_v40 }
0x27c6   : > { %v3403_v41 = vpop.eup %3402 }
0x27c7   : > { %v2410_v42 = vmul.f32 %v3403_v41, %v3604_v25  ;;  %v2430_v25 = vld [vmem:[%s4014_s7 + $0x8] sm:$0xff] }
0x27c8   : > { %v3293_v52 = vpack.c.bf16 %v2430_v25, %v2429_v62 }
0x27c9   : > { %v2411_v43 = vadd.f32 %v2410_v42, %v3608_v32  ;;  %v2431_v32 = vld [vmem:[%s4014_s7 + $0x10] sm:$0xff] }
0x27ca   : > { %3294 = vmatpush3.bf16.msra.mxu0 %v3293_v52  ;;  %v3296_v54 = vpack.c.bf16 %v2432_v53, %v2431_v32 }
0x27cb   : > { %2414 = vrot.lane.b32.xlu0 %v2411_v43, %s3438_s22  ;;  %v2412_v50 = vmul.f32 %v2411_v43, %v2325_v0  ;;  %3295 = vmatprep.subr.bf16.mxu0 %v3434_v11 }
0x27ce   : > { %3297 = vmatpush3.bf16.msra.mxu0 %v3296_v54 }
0x27cf   : > { %3304 = vmatprep.subr.bf16.mxu0 %v3434_v11 }
0x283d   : > { %v2415_v45 = vpop.permute.xlu0 %2414 }
0x283e   : > { %v2417_v48 = vmul.f32 %v2415_v45, %v2411_v43 }
0x2840   : > { %2419 = vrot.lane.b32.xlu1 %v2417_v48, %s3439_s23 }
0x28b2   : > { %v2420_v7 = vpop.permute.xlu1 %2419 }
0x28b3   : > { %v2422_v13 = vadd.f32 %v2420_v7, %v2412_v50 }
0x28b5   : > { %3404 = vtanh.f32 %v2422_v13 }
0x28bf   : > { %v3405_v55 = vpop.eup %3404 }
0x28c0   : > { %2425 = vrot.lane.b32.xlu0 %v3405_v55, %s3438_s22 }
0x2932   : > { %v2426_v56 = vpop.permute.xlu0 %2425 }
0x2933   : > { %v2428_v44 = vmul.f32 %v2426_v56, %v2411_v43 }
0x2935   : > { %2441 = vrot.lane.b32.xlu1 %v2428_v44, %s3439_s23  ;;  %s544_s23 = scalar_lea.vmem %s4021_s14, %s2786_s21 }
0x29a7   : > { %v2442_v57 = vpop.permute.xlu1 %2441 }
0x29a8   : > { %3164 = vmatmul.mubr.msk.f32.vlgmr.msra.gmra.mrb[28].mxu0 %vm705_vm5, %v2442_v57 }
0x29a9   : > { %3185 = vmatprep.mubr.msk.f32.mxu0 %vm3435_vm2, %v3436_v15  ;;  %v2821_v15 = vld [vmem:[%s4015_s8] ss:$0 sm:$0xff]  ;;  %3306 = vmatpush3.bf16.msra.mxu0 %v3305_v49 }
0x29aa   : > { %3307 = vmatprep.subr.bf16.mxu0 %v3434_v11  ;;  %v2600_v11 = vld [vmem:[%s540_s26] sm:$0xff] }
0x29ad   : > { %3309 = vmatpush3.bf16.msra.mxu0 %v3308_v19 }
0x2a7b   : > { %v2511_v3 = vpop.f32.mrb[28].mxu0 }
0x2a7c   : > { %v2512_v5 = vadd.f32 %v2821_v15, %v2511_v3  ;;  %v3165_v8 = vpop.f32.mrb[29].mxu0 }
0x2a7e   : > { %3406 = vtanh.f32 %v2512_v5 }
0x2a88   : > { %v3407_v9 = vpop.eup %3406 }
0x2a89   : > { %3175 = vmatmul.mubr.msk.f32.vlgmr.msra.gmra.mrb[20].mxu1 %vm705_vm5, %v3407_v9 }
0x2b5c   : > { %v2596_v60 = vpop.f32.mrb[20].mxu1 }
0x2b5d   : > { %v2597_v12 = vadd.f32 %v2823_v10, %v2596_v60  ;;  %v3176_v14 = vpop.f32.mrb[21].mxu1 }
0x2b5f   : > { %v2601_v63 = vmul.f32 0.5, %v2597_v12  ;;  %2697 = vrot.lane.b32.xlu1 %v2597_v12, %s3440_s24 }
0x2b61   : > { %v2602_v18 = vmul.f32 1.442695, %v2601_v63 }
0x2b63   : > { %3408 = vpow2.f32 %v2602_v18 }
0x2b6d   : > { %v3409_v6 = vpop.eup %3408 }
0x2b6e   : > { %2605 = vrot.lane.b32.xlu0 %v3409_v6, %s3441_s19 }
0x2bd1   : > { %v2698_v30 = vpop.permute.xlu1 %2697 }
0x2be0   : > { %v2606_v47 = vpop.permute.xlu0 %2605 }
0x2be1   : > { %v2608_v21 = vmul.f32 %v2606_v47, %v2600_v11 }
0x2be3   : > { %v2609_v22 = vadd.f32 %v2608_v21, %v2597_v12 }
0x2be5   : > { %v2610_v23 = vadd.f32 1.0, %v2609_v22 }
0x2be7   : > { %v2611_v24 = vmul.f32 %v3407_v9, %v2610_v23 }
0x2be9   : > { %3186 = vmatmul.mubr.msk.f32.vlgmr.msra.gmra.mrb[30].mxu0 %vm705_vm5, %v2611_v24 }
0x2cbc   : > { %v2692_v27 = vpop.f32.mrb[30].mxu0 }
0x2cbd   : > { %v2693_v28 = vadd.f32 %v2825_v26, %v2692_v27  ;;  %v3187_v29 = vpop.f32.mrb[31].mxu0 }
0x2cbf   : > { %v2701_v31 = vsel %vm2700_vm6, %v2693_v28, %v2698_v30 }
0x2cc0   : > { %v2703_v0 = vsel %vm2702_vm7, %v2701_v31, %v2698_v30 }
0x2cc1   : > { %v2705_v33 = vsel %vm2704_vm8, %v2703_v0, 0.0 }
0x2cc2   : > { %2706 = vst [vmem:[%s544_s23] sm:$0xff] %v2705_v33 }
0x2cc3 PF: > { %p21_p9 = scmp.ge.s32.totalorder %s3534_s17, 4   ;;  %s4022_s29 = smov %s3428_s30 }
0x2cc4   : > { %s4023_s30 = smov %s3543_s20  ;;  %s4024_s15 = smov %s3534_s17 }
0x2cc5   :  { %23 = sbr.rel (!%p21_p9) target bundleno = 2 (0x2), region = 159 }

</bundles_post_ra>
